<compile_context>
chip_gen: v7x
topology: tpu7x:2x2x1
jax: 0.10.0
libtpu: 0.0.40
codegen_flags: <defaults>
</compile_context>

<pallas_src>
import jax
import jax.numpy as jnp
from jax.experimental import pallas as pl
from jax.experimental.pallas import tpu as pltpu

# ---------------- synthetic CLIP vision config (small) ----------------
IMAGE_SIZE = 16
PATCH = 8
CHANNELS = 3
HIDDEN = 32
HEADS = 4
HEAD_DIM = HIDDEN // HEADS
INTERMEDIATE = 4 * HIDDEN
NUM_LAYERS = 2
SELECT_LAYER = -2          # args.mm_vision_select_layer
SELECT_FEATURE = "patch"   # args.mm_vision_select_feature
EPS = 1e-5
SCALE = HEAD_DIM ** -0.5

N_PATCHES = (IMAGE_SIZE // PATCH) ** 2      # 4
SEQ = N_PATCHES + 1                         # 5 (CLS + patches)
SEQ_PAD = 8                                 # sublane-aligned sequence length
SEQ_PAD_LOG2 = 3
assert (1 << SEQ_PAD_LOG2) == SEQ_PAD
PATCH_DIM = CHANNELS * PATCH * PATCH        # 192
NEG_INF = -1e30

# hidden_states has NUM_LAYERS+1 entries; only layers 0..SELECT_INDEX-1 are needed
SELECT_INDEX = SELECT_LAYER % (NUM_LAYERS + 1)   # = 1
LAYERS_NEEDED = SELECT_INDEX                     # run just layer 0
assert LAYERS_NEEDED >= 1

# packed-slab geometry
WSLAB_LANES = 3 * HIDDEN + HIDDEN + INTERMEDIATE   # Wqkv | Wo | W1  -> 256 lanes
BIAS_ROWS = 8
BIAS_LANES = max(128, INTERMEDIATE, 3 * HIDDEN)    # 128


# ---------------- kernel helpers ----------------
def _layernorm(x, g, b):
    mu = jnp.mean(x, axis=-1, keepdims=True)
    var = jnp.mean(jnp.square(x - mu), axis=-1, keepdims=True)
    return (x - mu) * jax.lax.rsqrt(var + EPS) * g + b


# ---------------- fused tower kernel ----------------
# grid = (batch_tiles [parallel], layers [arbitrary]); hidden state carried in
# a VMEM scratch across the layer axis, layer weights streamed per layer step.
def tower_kernel(patches_ref, patch_w_ref, pos_ref, preln_ref,
                 wslab_ref, w2_ref, bias_ref, o_ref, x_ref):
    l = pl.program_id(1)
    num_l = pl.num_programs(1)
    m = x_ref.shape[0]                                     # B_TILE * SEQ_PAD

    # --- embeddings + pre-LN -> hidden_states[0] (first layer step only) ---
    @pl.when(l == 0)
    def _():
        pe = jnp.dot(patches_ref[0], patch_w_ref[...],
                     preferred_element_type=jnp.float32)   # (M, HIDDEN)
        # CLS is pre-folded into pos row 0 of each image (patch row 0 is zero).
        x0 = pe + pos_ref[...]
        x_ref[...] = _layernorm(x0, preln_ref[0:1, :], preln_ref[1:2, :])

    x = x_ref[...]

    # --- unpack this layer's packed slabs (static lane/sublane slices) ---
    wslab = wslab_ref[0]                                   # (HIDDEN, 256) bf16
    wqkv = wslab[:, :3 * HIDDEN]
    wo = wslab[:, 3 * HIDDEN:4 * HIDDEN]
    w1 = wslab[:, 4 * HIDDEN:4 * HIDDEN + INTERMEDIATE]
    w2 = w2_ref[0]                                         # (INTERMEDIATE, HIDDEN) bf16
    bias = bias_ref[0]                                     # (8, 128) f32
    ln1g, ln1b = bias[0:1, :HIDDEN], bias[1:2, :HIDDEN]
    bqkv = bias[2:3, :3 * HIDDEN]                          # bq*scale | bk | bv
    bo = bias[3:4, :HIDDEN]
    ln2g, ln2b = bias[4:5, :HIDDEN], bias[5:6, :HIDDEN]
    b1 = bias[6:7, :INTERMEDIATE]
    b2 = bias[7:8, :HIDDEN]

    # block-diagonal key mask: attention may not cross images, padded key rows masked
    qi = jax.lax.broadcasted_iota(jnp.int32, (m, m), 0)
    ki = jax.lax.broadcasted_iota(jnp.int32, (m, m), 1)
    same_img = jax.lax.shift_right_logical(qi, SEQ_PAD_LOG2) == \
               jax.lax.shift_right_logical(ki, SEQ_PAD_LOG2)
    valid_key = jax.lax.bitwise_and(ki, SEQ_PAD - 1) < SEQ
    key_bias = jnp.where(same_img & valid_key, 0.0, NEG_INF)      # (M, M) f32

    # --- self-attention block (pre-LN), fused QKV projection ---
    xn = _layernorm(x, ln1g, ln1b).astype(jnp.bfloat16)
    qkv = jnp.dot(xn, wqkv, preferred_element_type=jnp.float32) + bqkv   # (M, 3H)
    q = qkv[:, :HIDDEN]                                    # SCALE already folded in
    k = qkv[:, HIDDEN:2 * HIDDEN]
    v = qkv[:, 2 * HIDDEN:3 * HIDDEN]

    ctx_parts = []
    for h in range(HEADS):
        d0 = h * HEAD_DIM
        qh = q[:, d0:d0 + HEAD_DIM].astype(jnp.bfloat16)
        kh = k[:, d0:d0 + HEAD_DIM].astype(jnp.bfloat16)
        vh = v[:, d0:d0 + HEAD_DIM].astype(jnp.bfloat16)
        s = jax.lax.dot_general(qh, kh, (((1,), (1,)), ((), ())),
                                preferred_element_type=jnp.float32) + key_bias
        s = s - jnp.max(s, axis=-1, keepdims=True)
        p = jnp.exp(s)
        # approx reciprocal hits the EUP slot; ~1e-3 rel. error vs exact divide.
        p = p * pl.reciprocal(jnp.sum(p, axis=-1, keepdims=True), approx=True)
        ctx_parts.append(jnp.dot(p.astype(jnp.bfloat16), vh,
                                 preferred_element_type=jnp.float32))
    ctx = jnp.concatenate(ctx_parts, axis=-1)              # (M, HIDDEN), heads on lanes
    attn = jnp.dot(ctx.astype(jnp.bfloat16), wo,
                   preferred_element_type=jnp.float32) + bo
    x = x + attn

    # --- MLP block (pre-LN, quick_gelu) ---
    h2 = _layernorm(x, ln2g, ln2b).astype(jnp.bfloat16)
    f = jnp.dot(h2, w1, preferred_element_type=jnp.float32) + b1
    f = f * jax.nn.sigmoid(1.702 * f)
    x = x + jnp.dot(f.astype(jnp.bfloat16), w2,
                    preferred_element_type=jnp.float32) + b2

    x_ref[...] = x

    @pl.when(l == num_l - 1)
    def _():
        o_ref[0] = x


# ---------------- wrapper-side parameter packing (layout plumbing) ----------------
def _build_layer_slabs(layer_params):
    wslabs, w2s, bslabs = [], [], []
    for lp in layer_params:
        wqkv = jnp.concatenate([lp["wq"] * SCALE, lp["wk"], lp["wv"]], axis=1)
        wslab = jnp.concatenate([wqkv, lp["wo"], lp["w1"]], axis=1)     # (H, 256)
        wslabs.append(wslab.astype(jnp.bfloat16))
        w2s.append(lp["w2"].astype(jnp.bfloat16))
        bqkv = jnp.concatenate([lp["bq"] * SCALE, lp["bk"], lp["bv"]], axis=1)
        rows = [lp["ln1_g"], lp["ln1_b"], bqkv, lp["bo"],
                lp["ln2_g"], lp["ln2_b"], lp["b1"], lp["b2"]]
        bias = jnp.zeros((BIAS_ROWS, BIAS_LANES), jnp.float32)
        for r, vec in enumerate(rows):
            bias = bias.at[r, :vec.shape[1]].set(vec[0])
        bslabs.append(bias)
    return jnp.stack(wslabs), jnp.stack(w2s), jnp.stack(bslabs)


def clip_vision_tower_forward(images, params):
    """images: (B, C, H, W) float32, NCHW (PyTorch convention)."""
    B = images.shape[0]
    x = images.astype(jnp.float32)

    # unfold into non-overlapping patches, row-major over (h, w): (B, N_PATCHES, PATCH_DIM)
    hb = IMAGE_SIZE // PATCH
    patches = x.reshape(B, CHANNELS, hb, PATCH, hb, PATCH)
    patches = patches.transpose(0, 2, 4, 1, 3, 5).reshape(B, N_PATCHES, PATCH_DIM)
    # patch p -> row p+1 (row 0 reserved for CLS), pad sequence to SEQ_PAD rows
    patches_pad = jnp.zeros((B, SEQ_PAD, PATCH_DIM), jnp.float32)
    patches_pad = patches_pad.at[:, 1:SEQ, :].set(patches)

    # batch tiling: aim for ~128 rows per MXU pass, but keep >=2 parallel steps
    # when the batch allows so v7x's two TensorCores both get work.
    b_tile = max(1, min(128 // SEQ_PAD, (B + 1) // 2))
    num_tiles = -(-B // b_tile)
    b_pad = num_tiles * b_tile
    if b_pad > B:
        patches_pad = jnp.concatenate(
            [patches_pad, jnp.zeros((b_pad - B, SEQ_PAD, PATCH_DIM), jnp.float32)],
            axis=0)
    m = b_tile * SEQ_PAD
    patches_tiles = patches_pad.reshape(num_tiles, m, PATCH_DIM).astype(jnp.bfloat16)

    # positional embedding with CLS folded into row 0, padded and tiled per batch tile
    pos_cls = jnp.zeros((SEQ_PAD, HIDDEN), jnp.float32).at[:SEQ, :].set(params["pos"])
    pos_cls = pos_cls.at[0, :].add(params["cls"][0])
    pos_cls = jnp.tile(pos_cls, (b_tile, 1))                        # (M, HIDDEN)

    preln = jnp.concatenate([params["pre_ln_g"], params["pre_ln_b"]], axis=0)  # (2, H)

    wslab, w2s, bslab = _build_layer_slabs(params["layers"][:LAYERS_NEEDED])

    hidden = pl.pallas_call(
        tower_kernel,
        grid=(num_tiles, LAYERS_NEEDED),
        in_specs=[
            pl.BlockSpec((1, m, PATCH_DIM), lambda b, l: (b, 0, 0)),
            pl.BlockSpec((PATCH_DIM, HIDDEN), lambda b, l: (0, 0)),
            pl.BlockSpec((m, HIDDEN), lambda b, l: (0, 0)),
            pl.BlockSpec((2, HIDDEN), lambda b, l: (0, 0)),
            pl.BlockSpec((1, HIDDEN, WSLAB_LANES), lambda b, l: (l, 0, 0)),
            pl.BlockSpec((1, INTERMEDIATE, HIDDEN), lambda b, l: (l, 0, 0)),
            pl.BlockSpec((1, BIAS_ROWS, BIAS_LANES), lambda b, l: (l, 0, 0)),
        ],
        out_specs=pl.BlockSpec((1, m, HIDDEN), lambda b, l: (b, 0, 0)),
        out_shape=jax.ShapeDtypeStruct((num_tiles, m, HIDDEN), jnp.float32),
        scratch_shapes=[pltpu.VMEM((m, HIDDEN), jnp.float32)],
        compiler_params=pltpu.CompilerParams(
            dimension_semantics=("parallel", "arbitrary")),
    )(patches_tiles, params["patch_w"].astype(jnp.bfloat16), pos_cls, preln,
      wslab, w2s, bslab)

    # feature_select on hidden_states[SELECT_LAYER] (drop batch + sequence padding)
    hidden = hidden.reshape(b_pad, SEQ_PAD, HIDDEN)[:B]
    if SELECT_FEATURE == "patch":
        feats = hidden[:, 1:SEQ, :]
    elif SELECT_FEATURE == "cls_patch":
        feats = hidden[:, :SEQ, :]
    else:
        raise ValueError(f"Unexpected select feature: {SELECT_FEATURE}")
    return feats.astype(images.dtype)


# ---------------- deterministic parameter init ----------------
def init_params(key):
    std = 0.02
    ks = iter(jax.random.split(key, 8 + NUM_LAYERS * 8))
    params = {
        # nn.Linear-style weights stored pre-transposed: (in, out)
        "patch_w": jax.random.normal(next(ks), (PATCH_DIM, HIDDEN), jnp.float32) * std,
        "cls": jax.random.normal(next(ks), (1, HIDDEN), jnp.float32) * std,
        "pos": jax.random.normal(next(ks), (SEQ, HIDDEN), jnp.float32) * std,
        "pre_ln_g": jnp.ones((1, HIDDEN), jnp.float32),
        "pre_ln_b": jnp.zeros((1, HIDDEN), jnp.float32),
        "layers": [],
    }
    for _ in range(NUM_LAYERS):
        lp = {
            "ln1_g": jnp.ones((1, HIDDEN), jnp.float32),
            "ln1_b": jnp.zeros((1, HIDDEN), jnp.float32),
            "wq": jax.random.normal(next(ks), (HIDDEN, HIDDEN), jnp.float32) * std,
            "bq": jnp.zeros((1, HIDDEN), jnp.float32),
            "wk": jax.random.normal(next(ks), (HIDDEN, HIDDEN), jnp.float32) * std,
            "bk": jnp.zeros((1, HIDDEN), jnp.float32),
            "wv": jax.random.normal(next(ks), (HIDDEN, HIDDEN), jnp.float32) * std,
            "bv": jnp.zeros((1, HIDDEN), jnp.float32),
            "wo": jax.random.normal(next(ks), (HIDDEN, HIDDEN), jnp.float32) * std,
            "bo": jnp.zeros((1, HIDDEN), jnp.float32),
            "ln2_g": jnp.ones((1, HIDDEN), jnp.float32),
            "ln2_b": jnp.zeros((1, HIDDEN), jnp.float32),
            "w1": jax.random.normal(next(ks), (HIDDEN, INTERMEDIATE), jnp.float32) * std,
            "b1": jnp.zeros((1, INTERMEDIATE), jnp.float32),
            "w2": jax.random.normal(next(ks), (INTERMEDIATE, HIDDEN), jnp.float32) * std,
            "b2": jnp.zeros((1, HIDDEN), jnp.float32),
        }
        params["layers"].append(lp)
    return params


if __name__ == "__main__":
    key = jax.random.PRNGKey(0)
    pk, ik = jax.random.split(key)
    params = init_params(pk)
    images = jax.random.normal(ik, (4, CHANNELS, IMAGE_SIZE, IMAGE_SIZE), jnp.float32)

    fwd = jax.jit(clip_vision_tower_forward)
    feats = jax.block_until_ready(fwd(images, params))
    assert feats.shape == (4, N_PATCHES, HIDDEN), feats.shape
    assert feats.dtype == images.dtype
    print("KERNEL_OK")
</pallas_src>

<mosaic_0001>
module attributes {stable_mosaic.version = 11 : i64} {
  func.func @tower_kernel(%arg0: i32, %arg1: i32, %arg2: memref<1x16x192xbf16, #tpu.memory_space<vmem>>, %arg3: memref<192x32xbf16, #tpu.memory_space<vmem>>, %arg4: memref<16x32xf32, #tpu.memory_space<vmem>>, %arg5: memref<2x32xf32, #tpu.memory_space<vmem>>, %arg6: memref<1x32x256xbf16, #tpu.memory_space<vmem>>, %arg7: memref<1x128x32xbf16, #tpu.memory_space<vmem>>, %arg8: memref<1x8x128xf32, #tpu.memory_space<vmem>>, %arg9: memref<1x16x32xf32, #tpu.memory_space<vmem>>, %arg10: memref<16x32xf32, #tpu.memory_space<vmem>>) attributes {dimension_semantics = [#tpu.dimension_semantics<parallel>, #tpu.dimension_semantics<arbitrary>], iteration_bounds = array<i64: 2, 1>, scalar_prefetch = 0 : i64, scratch_operands = 1 : i64, tpu.core_type = #tpu.core_type<tc>, window_params = [{transform_indices = @transform_0, window_bounds = array<i64: 1, 16, 192>}, {pipeline_mode = #tpu.pipeline_mode<synchronous>, transform_indices = @transform_1, window_bounds = array<i64: 192, 32>}, {pipeline_mode = #tpu.pipeline_mode<synchronous>, transform_indices = @transform_2, window_bounds = array<i64: 16, 32>}, {pipeline_mode = #tpu.pipeline_mode<synchronous>, transform_indices = @transform_3, window_bounds = array<i64: 2, 32>}, {transform_indices = @transform_4, window_bounds = array<i64: 1, 32, 256>}, {transform_indices = @transform_5, window_bounds = array<i64: 1, 128, 32>}, {transform_indices = @transform_6, window_bounds = array<i64: 1, 8, 128>}, {transform_indices = @transform_7, window_bounds = array<i64: 1, 16, 32>}]} {
    %c0_i32 = arith.constant 0 : i32
    %0 = arith.cmpi eq, %arg1, %c0_i32 : i32
    %1 = arith.extui %0 : i1 to i32
    %c0_i32_0 = arith.constant 0 : i32
    %2 = arith.cmpi ne, %1, %c0_i32_0 : i32
    scf.if %2 {
      %c0_49 = arith.constant 0 : index
      %c0_50 = arith.constant 0 : index
      %c0_51 = arith.constant 0 : index
      %194 = vector.load %arg2[%c0_49, %c0_50, %c0_51] : memref<1x16x192xbf16, #tpu.memory_space<vmem>>, vector<1x16x192xbf16>
      %195 = vector.shape_cast %194 : vector<1x16x192xbf16> to vector<16x192xbf16>
      %c0_52 = arith.constant 0 : index
      %c0_53 = arith.constant 0 : index
      %196 = vector.load %arg3[%c0_52, %c0_53] : memref<192x32xbf16, #tpu.memory_space<vmem>>, vector<192x32xbf16>
      %cst_54 = arith.constant dense<0.000000e+00> : vector<16x32xf32>
      %197 = tpu.matmul %195, %196, %cst_54 {dimension_numbers = #tpu.dot_dimension_numbers<[1], [0], [0], [1], [0, 0, 1, 1], [], []>} : vector<16x192xbf16>, vector<192x32xbf16>, vector<16x32xf32> -> vector<16x32xf32>
      %c0_55 = arith.constant 0 : index
      %c0_56 = arith.constant 0 : index
      %198 = vector.load %arg4[%c0_55, %c0_56] : memref<16x32xf32, #tpu.memory_space<vmem>>, vector<16x32xf32>
      %199 = arith.addf %197, %198 : vector<16x32xf32>
      %c0_57 = arith.constant 0 : index
      %c0_58 = arith.constant 0 : index
      %200 = vector.load %arg5[%c0_57, %c0_58] : memref<2x32xf32, #tpu.memory_space<vmem>>, vector<1x32xf32>
      %c1 = arith.constant 1 : index
      %c0_59 = arith.constant 0 : index
      %201 = vector.load %arg5[%c1, %c0_59] : memref<2x32xf32, #tpu.memory_space<vmem>>, vector<1x32xf32>
      %cst_60 = arith.constant dense<0.000000e+00> : vector<16xf32>
      %202 = vector.multi_reduction <add>, %199, %cst_60 [1] : vector<16x32xf32> to vector<16xf32>
      %203 = vector.shape_cast %202 : vector<16xf32> to vector<16x1xf32>
      %cst_61 = arith.constant 3.200000e+01 : f32
      %204 = vector.broadcast %cst_61 : f32 to vector<16x1xf32>
      %205 = arith.divf %203, %204 : vector<16x1xf32>
      %206 = vector.broadcast %205 : vector<16x1xf32> to vector<16x32xf32>
      %207 = arith.subf %199, %206 : vector<16x32xf32>
      %208 = arith.mulf %207, %207 : vector<16x32xf32>
      %cst_62 = arith.constant dense<0.000000e+00> : vector<16xf32>
      %209 = vector.multi_reduction <add>, %208, %cst_62 [1] : vector<16x32xf32> to vector<16xf32>
      %210 = vector.shape_cast %209 : vector<16xf32> to vector<16x1xf32>
      %cst_63 = arith.constant 3.200000e+01 : f32
      %211 = vector.broadcast %cst_63 : f32 to vector<16x1xf32>
      %212 = arith.divf %210, %211 : vector<16x1xf32>
      %213 = vector.broadcast %205 : vector<16x1xf32> to vector<16x32xf32>
      %214 = arith.subf %199, %213 : vector<16x32xf32>
      %cst_64 = arith.constant 9.99999974E-6 : f32
      %215 = vector.broadcast %cst_64 : f32 to vector<16x1xf32>
      %216 = arith.addf %212, %215 : vector<16x1xf32>
      %217 = math.rsqrt %216 : vector<16x1xf32>
      %218 = vector.broadcast %217 : vector<16x1xf32> to vector<16x32xf32>
      %219 = arith.mulf %214, %218 : vector<16x32xf32>
      %220 = vector.broadcast %200 : vector<1x32xf32> to vector<16x32xf32>
      %221 = arith.mulf %219, %220 : vector<16x32xf32>
      %222 = vector.broadcast %201 : vector<1x32xf32> to vector<16x32xf32>
      %223 = arith.addf %221, %222 : vector<16x32xf32>
      %c0_65 = arith.constant 0 : index
      %c0_66 = arith.constant 0 : index
      %224 = vector.load %arg10[%c0_65, %c0_66] : memref<16x32xf32, #tpu.memory_space<vmem>>, vector<16x32xf32>
      tpu.vector_store %arg10[%c0_65, %c0_66], %223 {strides = array<i32>} : memref<16x32xf32, #tpu.memory_space<vmem>>, vector<16x32xf32>,
    } else {
    }
    %c0 = arith.constant 0 : index
    %c0_1 = arith.constant 0 : index
    %3 = vector.load %arg10[%c0, %c0_1] : memref<16x32xf32, #tpu.memory_space<vmem>>, vector<16x32xf32>
    %c0_2 = arith.constant 0 : index
    %c0_3 = arith.constant 0 : index
    %c0_4 = arith.constant 0 : index
    %4 = vector.load %arg6[%c0_2, %c0_3, %c0_4] : memref<1x32x256xbf16, #tpu.memory_space<vmem>>, vector<1x32x256xbf16>
    %5 = vector.shape_cast %4 : vector<1x32x256xbf16> to vector<32x256xbf16>
    %6 = vector.extract_strided_slice %5 {offsets = [0, 0], sizes = [32, 96], strides = [1, 1]} : vector<32x256xbf16> to vector<32x96xbf16>
    %7 = vector.extract_strided_slice %5 {offsets = [0, 96], sizes = [32, 32], strides = [1, 1]} : vector<32x256xbf16> to vector<32x32xbf16>
    %8 = vector.extract_strided_slice %5 {offsets = [0, 128], sizes = [32, 128], strides = [1, 1]} : vector<32x256xbf16> to vector<32x128xbf16>
    %c0_5 = arith.constant 0 : index
    %c0_6 = arith.constant 0 : index
    %c0_7 = arith.constant 0 : index
    %9 = vector.load %arg7[%c0_5, %c0_6, %c0_7] : memref<1x128x32xbf16, #tpu.memory_space<vmem>>, vector<1x128x32xbf16>
    %10 = vector.shape_cast %9 : vector<1x128x32xbf16> to vector<128x32xbf16>
    %c0_8 = arith.constant 0 : index
    %c0_9 = arith.constant 0 : index
    %c0_10 = arith.constant 0 : index
    %11 = vector.load %arg8[%c0_8, %c0_9, %c0_10] : memref<1x8x128xf32, #tpu.memory_space<vmem>>, vector<1x8x128xf32>
    %12 = vector.shape_cast %11 : vector<1x8x128xf32> to vector<8x128xf32>
    %13 = vector.extract_strided_slice %12 {offsets = [0, 0], sizes = [1, 32], strides = [1, 1]} : vector<8x128xf32> to vector<1x32xf32>
    %14 = vector.extract_strided_slice %12 {offsets = [1, 0], sizes = [1, 32], strides = [1, 1]} : vector<8x128xf32> to vector<1x32xf32>
    %15 = vector.extract_strided_slice %12 {offsets = [2, 0], sizes = [1, 96], strides = [1, 1]} : vector<8x128xf32> to vector<1x96xf32>
    %16 = vector.extract_strided_slice %12 {offsets = [3, 0], sizes = [1, 32], strides = [1, 1]} : vector<8x128xf32> to vector<1x32xf32>
    %17 = vector.extract_strided_slice %12 {offsets = [4, 0], sizes = [1, 32], strides = [1, 1]} : vector<8x128xf32> to vector<1x32xf32>
    %18 = vector.extract_strided_slice %12 {offsets = [5, 0], sizes = [1, 32], strides = [1, 1]} : vector<8x128xf32> to vector<1x32xf32>
    %19 = vector.extract_strided_slice %12 {offsets = [6, 0], sizes = [1, 128], strides = [1, 1]} : vector<8x128xf32> to vector<1x128xf32>
    %20 = vector.extract_strided_slice %12 {offsets = [7, 0], sizes = [1, 32], strides = [1, 1]} : vector<8x128xf32> to vector<1x32xf32>
    %21 = tpu.iota {dimensions = array<i32: 0>} : vector<16x16xi32>
    %22 = tpu.iota {dimensions = array<i32: 1>} : vector<16x16xi32>
    %c3_i32 = arith.constant 3 : i32
    %23 = vector.broadcast %c3_i32 : i32 to vector<16x16xi32>
    %24 = arith.shrui %21, %23 : vector<16x16xi32>
    %c3_i32_11 = arith.constant 3 : i32
    %25 = vector.broadcast %c3_i32_11 : i32 to vector<16x16xi32>
    %26 = arith.shrui %22, %25 : vector<16x16xi32>
    %27 = arith.cmpi eq, %24, %26 : vector<16x16xi32>
    %c7_i32 = arith.constant 7 : i32
    %28 = vector.broadcast %c7_i32 : i32 to vector<16x16xi32>
    %29 = arith.andi %22, %28 : vector<16x16xi32>
    %c5_i32 = arith.constant 5 : i32
    %30 = vector.broadcast %c5_i32 : i32 to vector<16x16xi32>
    %31 = arith.cmpi slt, %29, %30 : vector<16x16xi32>
    %32 = arith.andi %27, %31 : vector<16x16xi1>
    %cst = arith.constant 0.000000e+00 : f32
    %cst_12 = arith.constant -1.000000e+30 : f32
    %33 = vector.broadcast %cst : f32 to vector<16x16xf32>
    %34 = vector.broadcast %cst_12 : f32 to vector<16x16xf32>
    %35 = arith.select %32, %33, %34 : vector<16x16xi1>, vector<16x16xf32>
    %cst_13 = arith.constant dense<0.000000e+00> : vector<16xf32>
    %36 = vector.multi_reduction <add>, %3, %cst_13 [1] : vector<16x32xf32> to vector<16xf32>
    %37 = vector.shape_cast %36 : vector<16xf32> to vector<16x1xf32>
    %cst_14 = arith.constant 3.200000e+01 : f32
    %38 = vector.broadcast %cst_14 : f32 to vector<16x1xf32>
    %39 = arith.divf %37, %38 : vector<16x1xf32>
    %40 = vector.broadcast %39 : vector<16x1xf32> to vector<16x32xf32>
    %41 = arith.subf %3, %40 : vector<16x32xf32>
    %42 = arith.mulf %41, %41 : vector<16x32xf32>
    %cst_15 = arith.constant dense<0.000000e+00> : vector<16xf32>
    %43 = vector.multi_reduction <add>, %42, %cst_15 [1] : vector<16x32xf32> to vector<16xf32>
    %44 = vector.shape_cast %43 : vector<16xf32> to vector<16x1xf32>
    %cst_16 = arith.constant 3.200000e+01 : f32
    %45 = vector.broadcast %cst_16 : f32 to vector<16x1xf32>
    %46 = arith.divf %44, %45 : vector<16x1xf32>
    %47 = vector.broadcast %39 : vector<16x1xf32> to vector<16x32xf32>
    %48 = arith.subf %3, %47 : vector<16x32xf32>
    %cst_17 = arith.constant 9.99999974E-6 : f32
    %49 = vector.broadcast %cst_17 : f32 to vector<16x1xf32>
    %50 = arith.addf %46, %49 : vector<16x1xf32>
    %51 = math.rsqrt %50 : vector<16x1xf32>
    %52 = vector.broadcast %51 : vector<16x1xf32> to vector<16x32xf32>
    %53 = arith.mulf %48, %52 : vector<16x32xf32>
    %54 = vector.broadcast %13 : vector<1x32xf32> to vector<16x32xf32>
    %55 = arith.mulf %53, %54 : vector<16x32xf32>
    %56 = vector.broadcast %14 : vector<1x32xf32> to vector<16x32xf32>
    %57 = arith.addf %55, %56 : vector<16x32xf32>
    %58 = arith.truncf %57 : vector<16x32xf32> to vector<16x32xbf16>
    %cst_18 = arith.constant dense<0.000000e+00> : vector<16x96xf32>
    %59 = tpu.matmul %58, %6, %cst_18 {dimension_numbers = #tpu.dot_dimension_numbers<[1], [0], [0], [1], [0, 0, 1, 1], [], []>} : vector<16x32xbf16>, vector<32x96xbf16>, vector<16x96xf32> -> vector<16x96xf32>
    %60 = vector.broadcast %15 : vector<1x96xf32> to vector<16x96xf32>
    %61 = arith.addf %59, %60 : vector<16x96xf32>
    %62 = vector.extract_strided_slice %61 {offsets = [0, 0], sizes = [16, 32], strides = [1, 1]} : vector<16x96xf32> to vector<16x32xf32>
    %63 = vector.extract_strided_slice %61 {offsets = [0, 32], sizes = [16, 32], strides = [1, 1]} : vector<16x96xf32> to vector<16x32xf32>
    %64 = vector.extract_strided_slice %61 {offsets = [0, 64], sizes = [16, 32], strides = [1, 1]} : vector<16x96xf32> to vector<16x32xf32>
    %65 = vector.extract_strided_slice %62 {offsets = [0, 0], sizes = [16, 8], strides = [1, 1]} : vector<16x32xf32> to vector<16x8xf32>
    %66 = arith.truncf %65 : vector<16x8xf32> to vector<16x8xbf16>
    %67 = vector.extract_strided_slice %63 {offsets = [0, 0], sizes = [16, 8], strides = [1, 1]} : vector<16x32xf32> to vector<16x8xf32>
    %68 = arith.truncf %67 : vector<16x8xf32> to vector<16x8xbf16>
    %69 = vector.extract_strided_slice %64 {offsets = [0, 0], sizes = [16, 8], strides = [1, 1]} : vector<16x32xf32> to vector<16x8xf32>
    %70 = arith.truncf %69 : vector<16x8xf32> to vector<16x8xbf16>
    %cst_19 = arith.constant dense<0.000000e+00> : vector<16x16xf32>
    %71 = tpu.matmul %66, %68, %cst_19 {dimension_numbers = #tpu.dot_dimension_numbers<[1], [1], [0], [0], [0, 0, 1, 0], [], []>} : vector<16x8xbf16>, vector<16x8xbf16>, vector<16x16xf32> -> vector<16x16xf32>
    %72 = arith.addf %71, %35 : vector<16x16xf32>
    %cst_20 = arith.constant dense<0xFF800000> : vector<16xf32>
    %73 = vector.multi_reduction <maximumf>, %72, %cst_20 [1] : vector<16x16xf32> to vector<16xf32>
    %74 = vector.shape_cast %73 : vector<16xf32> to vector<16x1xf32>
    %75 = vector.broadcast %74 : vector<16x1xf32> to vector<16x16xf32>
    %76 = arith.subf %72, %75 : vector<16x16xf32>
    %77 = math.exp %76 : vector<16x16xf32>
    %cst_21 = arith.constant dense<0.000000e+00> : vector<16xf32>
    %78 = vector.multi_reduction <add>, %77, %cst_21 [1] : vector<16x16xf32> to vector<16xf32>
    %79 = vector.shape_cast %78 : vector<16xf32> to vector<16x1xf32>
    %80 = tpu.reciprocal %79 {approx = true} : vector<16x1xf32> -> vector<16x1xf32>
    %81 = vector.broadcast %80 : vector<16x1xf32> to vector<16x16xf32>
    %82 = arith.mulf %77, %81 : vector<16x16xf32>
    %83 = arith.truncf %82 : vector<16x16xf32> to vector<16x16xbf16>
    %cst_22 = arith.constant dense<0.000000e+00> : vector<16x8xf32>
    %84 = tpu.matmul %83, %70, %cst_22 {dimension_numbers = #tpu.dot_dimension_numbers<[1], [0], [0], [1], [0, 0, 1, 1], [], []>} : vector<16x16xbf16>, vector<16x8xbf16>, vector<16x8xf32> -> vector<16x8xf32>
    %85 = vector.extract_strided_slice %62 {offsets = [0, 8], sizes = [16, 8], strides = [1, 1]} : vector<16x32xf32> to vector<16x8xf32>
    %86 = arith.truncf %85 : vector<16x8xf32> to vector<16x8xbf16>
    %87 = vector.extract_strided_slice %63 {offsets = [0, 8], sizes = [16, 8], strides = [1, 1]} : vector<16x32xf32> to vector<16x8xf32>
    %88 = arith.truncf %87 : vector<16x8xf32> to vector<16x8xbf16>
    %89 = vector.extract_strided_slice %64 {offsets = [0, 8], sizes = [16, 8], strides = [1, 1]} : vector<16x32xf32> to vector<16x8xf32>
    %90 = arith.truncf %89 : vector<16x8xf32> to vector<16x8xbf16>
    %cst_23 = arith.constant dense<0.000000e+00> : vector<16x16xf32>
    %91 = tpu.matmul %86, %88, %cst_23 {dimension_numbers = #tpu.dot_dimension_numbers<[1], [1], [0], [0], [0, 0, 1, 0], [], []>} : vector<16x8xbf16>, vector<16x8xbf16>, vector<16x16xf32> -> vector<16x16xf32>
    %92 = arith.addf %91, %35 : vector<16x16xf32>
    %cst_24 = arith.constant dense<0xFF800000> : vector<16xf32>
    %93 = vector.multi_reduction <maximumf>, %92, %cst_24 [1] : vector<16x16xf32> to vector<16xf32>
    %94 = vector.shape_cast %93 : vector<16xf32> to vector<16x1xf32>
    %95 = vector.broadcast %94 : vector<16x1xf32> to vector<16x16xf32>
    %96 = arith.subf %92, %95 : vector<16x16xf32>
    %97 = math.exp %96 : vector<16x16xf32>
    %cst_25 = arith.constant dense<0.000000e+00> : vector<16xf32>
    %98 = vector.multi_reduction <add>, %97, %cst_25 [1] : vector<16x16xf32> to vector<16xf32>
    %99 = vector.shape_cast %98 : vector<16xf32> to vector<16x1xf32>
    %100 = tpu.reciprocal %99 {approx = true} : vector<16x1xf32> -> vector<16x1xf32>
    %101 = vector.broadcast %100 : vector<16x1xf32> to vector<16x16xf32>
    %102 = arith.mulf %97, %101 : vector<16x16xf32>
    %103 = arith.truncf %102 : vector<16x16xf32> to vector<16x16xbf16>
    %cst_26 = arith.constant dense<0.000000e+00> : vector<16x8xf32>
    %104 = tpu.matmul %103, %90, %cst_26 {dimension_numbers = #tpu.dot_dimension_numbers<[1], [0], [0], [1], [0, 0, 1, 1], [], []>} : vector<16x16xbf16>, vector<16x8xbf16>, vector<16x8xf32> -> vector<16x8xf32>
    %105 = vector.extract_strided_slice %62 {offsets = [0, 16], sizes = [16, 8], strides = [1, 1]} : vector<16x32xf32> to vector<16x8xf32>
    %106 = arith.truncf %105 : vector<16x8xf32> to vector<16x8xbf16>
    %107 = vector.extract_strided_slice %63 {offsets = [0, 16], sizes = [16, 8], strides = [1, 1]} : vector<16x32xf32> to vector<16x8xf32>
    %108 = arith.truncf %107 : vector<16x8xf32> to vector<16x8xbf16>
    %109 = vector.extract_strided_slice %64 {offsets = [0, 16], sizes = [16, 8], strides = [1, 1]} : vector<16x32xf32> to vector<16x8xf32>
    %110 = arith.truncf %109 : vector<16x8xf32> to vector<16x8xbf16>
    %cst_27 = arith.constant dense<0.000000e+00> : vector<16x16xf32>
    %111 = tpu.matmul %106, %108, %cst_27 {dimension_numbers = #tpu.dot_dimension_numbers<[1], [1], [0], [0], [0, 0, 1, 0], [], []>} : vector<16x8xbf16>, vector<16x8xbf16>, vector<16x16xf32> -> vector<16x16xf32>
    %112 = arith.addf %111, %35 : vector<16x16xf32>
    %cst_28 = arith.constant dense<0xFF800000> : vector<16xf32>
    %113 = vector.multi_reduction <maximumf>, %112, %cst_28 [1] : vector<16x16xf32> to vector<16xf32>
    %114 = vector.shape_cast %113 : vector<16xf32> to vector<16x1xf32>
    %115 = vector.broadcast %114 : vector<16x1xf32> to vector<16x16xf32>
    %116 = arith.subf %112, %115 : vector<16x16xf32>
    %117 = math.exp %116 : vector<16x16xf32>
    %cst_29 = arith.constant dense<0.000000e+00> : vector<16xf32>
    %118 = vector.multi_reduction <add>, %117, %cst_29 [1] : vector<16x16xf32> to vector<16xf32>
    %119 = vector.shape_cast %118 : vector<16xf32> to vector<16x1xf32>
    %120 = tpu.reciprocal %119 {approx = true} : vector<16x1xf32> -> vector<16x1xf32>
    %121 = vector.broadcast %120 : vector<16x1xf32> to vector<16x16xf32>
    %122 = arith.mulf %117, %121 : vector<16x16xf32>
    %123 = arith.truncf %122 : vector<16x16xf32> to vector<16x16xbf16>
    %cst_30 = arith.constant dense<0.000000e+00> : vector<16x8xf32>
    %124 = tpu.matmul %123, %110, %cst_30 {dimension_numbers = #tpu.dot_dimension_numbers<[1], [0], [0], [1], [0, 0, 1, 1], [], []>} : vector<16x16xbf16>, vector<16x8xbf16>, vector<16x8xf32> -> vector<16x8xf32>
    %125 = vector.extract_strided_slice %62 {offsets = [0, 24], sizes = [16, 8], strides = [1, 1]} : vector<16x32xf32> to vector<16x8xf32>
    %126 = arith.truncf %125 : vector<16x8xf32> to vector<16x8xbf16>
    %127 = vector.extract_strided_slice %63 {offsets = [0, 24], sizes = [16, 8], strides = [1, 1]} : vector<16x32xf32> to vector<16x8xf32>
    %128 = arith.truncf %127 : vector<16x8xf32> to vector<16x8xbf16>
    %129 = vector.extract_strided_slice %64 {offsets = [0, 24], sizes = [16, 8], strides = [1, 1]} : vector<16x32xf32> to vector<16x8xf32>
    %130 = arith.truncf %129 : vector<16x8xf32> to vector<16x8xbf16>
    %cst_31 = arith.constant dense<0.000000e+00> : vector<16x16xf32>
    %131 = tpu.matmul %126, %128, %cst_31 {dimension_numbers = #tpu.dot_dimension_numbers<[1], [1], [0], [0], [0, 0, 1, 0], [], []>} : vector<16x8xbf16>, vector<16x8xbf16>, vector<16x16xf32> -> vector<16x16xf32>
    %132 = arith.addf %131, %35 : vector<16x16xf32>
    %cst_32 = arith.constant dense<0xFF800000> : vector<16xf32>
    %133 = vector.multi_reduction <maximumf>, %132, %cst_32 [1] : vector<16x16xf32> to vector<16xf32>
    %134 = vector.shape_cast %133 : vector<16xf32> to vector<16x1xf32>
    %135 = vector.broadcast %134 : vector<16x1xf32> to vector<16x16xf32>
    %136 = arith.subf %132, %135 : vector<16x16xf32>
    %137 = math.exp %136 : vector<16x16xf32>
    %cst_33 = arith.constant dense<0.000000e+00> : vector<16xf32>
    %138 = vector.multi_reduction <add>, %137, %cst_33 [1] : vector<16x16xf32> to vector<16xf32>
    %139 = vector.shape_cast %138 : vector<16xf32> to vector<16x1xf32>
    %140 = tpu.reciprocal %139 {approx = true} : vector<16x1xf32> -> vector<16x1xf32>
    %141 = vector.broadcast %140 : vector<16x1xf32> to vector<16x16xf32>
    %142 = arith.mulf %137, %141 : vector<16x16xf32>
    %143 = arith.truncf %142 : vector<16x16xf32> to vector<16x16xbf16>
    %cst_34 = arith.constant dense<0.000000e+00> : vector<16x8xf32>
    %144 = tpu.matmul %143, %130, %cst_34 {dimension_numbers = #tpu.dot_dimension_numbers<[1], [0], [0], [1], [0, 0, 1, 1], [], []>} : vector<16x16xbf16>, vector<16x8xbf16>, vector<16x8xf32> -> vector<16x8xf32>
    %145 = tpu.concatenate %84, %104, %124, %144 in 1 : vector<16x8xf32>, vector<16x8xf32>, vector<16x8xf32>, vector<16x8xf32> -> vector<16x32xf32>
    %146 = arith.truncf %145 : vector<16x32xf32> to vector<16x32xbf16>
    %cst_35 = arith.constant dense<0.000000e+00> : vector<16x32xf32>
    %147 = tpu.matmul %146, %7, %cst_35 {dimension_numbers = #tpu.dot_dimension_numbers<[1], [0], [0], [1], [0, 0, 1, 1], [], []>} : vector<16x32xbf16>, vector<32x32xbf16>, vector<16x32xf32> -> vector<16x32xf32>
    %148 = vector.broadcast %16 : vector<1x32xf32> to vector<16x32xf32>
    %149 = arith.addf %147, %148 : vector<16x32xf32>
    %150 = arith.addf %3, %149 : vector<16x32xf32>
    %cst_36 = arith.constant dense<0.000000e+00> : vector<16xf32>
    %151 = vector.multi_reduction <add>, %150, %cst_36 [1] : vector<16x32xf32> to vector<16xf32>
    %152 = vector.shape_cast %151 : vector<16xf32> to vector<16x1xf32>
    %cst_37 = arith.constant 3.200000e+01 : f32
    %153 = vector.broadcast %cst_37 : f32 to vector<16x1xf32>
    %154 = arith.divf %152, %153 : vector<16x1xf32>
    %155 = vector.broadcast %154 : vector<16x1xf32> to vector<16x32xf32>
    %156 = arith.subf %150, %155 : vector<16x32xf32>
    %157 = arith.mulf %156, %156 : vector<16x32xf32>
    %cst_38 = arith.constant dense<0.000000e+00> : vector<16xf32>
    %158 = vector.multi_reduction <add>, %157, %cst_38 [1] : vector<16x32xf32> to vector<16xf32>
    %159 = vector.shape_cast %158 : vector<16xf32> to vector<16x1xf32>
    %cst_39 = arith.constant 3.200000e+01 : f32
    %160 = vector.broadcast %cst_39 : f32 to vector<16x1xf32>
    %161 = arith.divf %159, %160 : vector<16x1xf32>
    %162 = vector.broadcast %154 : vector<16x1xf32> to vector<16x32xf32>
    %163 = arith.subf %150, %162 : vector<16x32xf32>
    %cst_40 = arith.constant 9.99999974E-6 : f32
    %164 = vector.broadcast %cst_40 : f32 to vector<16x1xf32>
    %165 = arith.addf %161, %164 : vector<16x1xf32>
    %166 = math.rsqrt %165 : vector<16x1xf32>
    %167 = vector.broadcast %166 : vector<16x1xf32> to vector<16x32xf32>
    %168 = arith.mulf %163, %167 : vector<16x32xf32>
    %169 = vector.broadcast %17 : vector<1x32xf32> to vector<16x32xf32>
    %170 = arith.mulf %168, %169 : vector<16x32xf32>
    %171 = vector.broadcast %18 : vector<1x32xf32> to vector<16x32xf32>
    %172 = arith.addf %170, %171 : vector<16x32xf32>
    %173 = arith.truncf %172 : vector<16x32xf32> to vector<16x32xbf16>
    %cst_41 = arith.constant dense<0.000000e+00> : vector<16x128xf32>
    %174 = tpu.matmul %173, %8, %cst_41 {dimension_numbers = #tpu.dot_dimension_numbers<[1], [0], [0], [1], [0, 0, 1, 1], [], []>} : vector<16x32xbf16>, vector<32x128xbf16>, vector<16x128xf32> -> vector<16x128xf32>
    %175 = vector.broadcast %19 : vector<1x128xf32> to vector<16x128xf32>
    %176 = arith.addf %174, %175 : vector<16x128xf32>
    %cst_42 = arith.constant 1.702000e+00 : f32
    %177 = vector.broadcast %cst_42 : f32 to vector<16x128xf32>
    %178 = arith.mulf %177, %176 : vector<16x128xf32>
    %179 = arith.negf %178 : vector<16x128xf32>
    %180 = math.exp %179 : vector<16x128xf32>
    %cst_43 = arith.constant 1.000000e+00 : f32
    %181 = vector.broadcast %cst_43 : f32 to vector<16x128xf32>
    %182 = arith.addf %181, %180 : vector<16x128xf32>
    %183 = arith.divf %181, %182 : vector<16x128xf32>
    %184 = arith.mulf %176, %183 : vector<16x128xf32>
    %185 = arith.truncf %184 : vector<16x128xf32> to vector<16x128xbf16>
    %cst_44 = arith.constant dense<0.000000e+00> : vector<16x32xf32>
    %186 = tpu.matmul %185, %10, %cst_44 {dimension_numbers = #tpu.dot_dimension_numbers<[1], [0], [0], [1], [0, 0, 1, 1], [], []>} : vector<16x128xbf16>, vector<128x32xbf16>, vector<16x32xf32> -> vector<16x32xf32>
    %187 = arith.addf %150, %186 : vector<16x32xf32>
    %188 = vector.broadcast %20 : vector<1x32xf32> to vector<16x32xf32>
    %189 = arith.addf %187, %188 : vector<16x32xf32>
    %c0_45 = arith.constant 0 : index
    %c0_46 = arith.constant 0 : index
    %190 = vector.load %arg10[%c0_45, %c0_46] : memref<16x32xf32, #tpu.memory_space<vmem>>, vector<16x32xf32>
    tpu.vector_store %arg10[%c0_45, %c0_46], %189 {strides = array<i32>} : memref<16x32xf32, #tpu.memory_space<vmem>>, vector<16x32xf32>,
    %c0_i32_47 = arith.constant 0 : i32
    %191 = arith.cmpi eq, %arg1, %c0_i32_47 : i32
    %192 = arith.extui %191 : i1 to i32
    %c0_i32_48 = arith.constant 0 : i32
    %193 = arith.cmpi ne, %192, %c0_i32_48 : i32
    scf.if %193 {
      %c0_49 = arith.constant 0 : index
      %c0_50 = arith.constant 0 : index
      %c0_51 = arith.constant 0 : index
      %194 = vector.load %arg9[%c0_49, %c0_50, %c0_51] : memref<1x16x32xf32, #tpu.memory_space<vmem>>, vector<1x16x32xf32>
      %195 = vector.shape_cast %194 : vector<1x16x32xf32> to vector<16x32xf32>
      %196 = vector.shape_cast %189 : vector<16x32xf32> to vector<1x16x32xf32>
      tpu.vector_store %arg9[%c0_49, %c0_50, %c0_51], %196 {strides = array<i32>} : memref<1x16x32xf32, #tpu.memory_space<vmem>>, vector<1x16x32xf32>,
    } else {
    }
    return
  }
  func.func @transform_0(%arg0: i32, %arg1: i32) -> (i32, i32, i32) {
    %c0_i32 = arith.constant 0 : i32
    %c0_i32_0 = arith.constant 0 : i32
    %c0_i32_1 = arith.constant 0 : i32
    return %arg0, %c0_i32, %c0_i32_0 : i32, i32, i32
  }
  func.func @transform_1(%arg0: i32, %arg1: i32) -> (i32, i32) {
    %c0_i32 = arith.constant 0 : i32
    %c0_i32_0 = arith.constant 0 : i32
    %c0_i32_1 = arith.constant 0 : i32
    return %c0_i32, %c0_i32_0 : i32, i32
  }
  func.func @transform_2(%arg0: i32, %arg1: i32) -> (i32, i32) {
    %c0_i32 = arith.constant 0 : i32
    %c0_i32_0 = arith.constant 0 : i32
    %c0_i32_1 = arith.constant 0 : i32
    return %c0_i32, %c0_i32_0 : i32, i32
  }
  func.func @transform_3(%arg0: i32, %arg1: i32) -> (i32, i32) {
    %c0_i32 = arith.constant 0 : i32
    %c0_i32_0 = arith.constant 0 : i32
    %c0_i32_1 = arith.constant 0 : i32
    return %c0_i32, %c0_i32_0 : i32, i32
  }
  func.func @transform_4(%arg0: i32, %arg1: i32) -> (i32, i32, i32) {
    %c0_i32 = arith.constant 0 : i32
    %c0_i32_0 = arith.constant 0 : i32
    %c0_i32_1 = arith.constant 0 : i32
    return %arg1, %c0_i32, %c0_i32_0 : i32, i32, i32
  }
  func.func @transform_5(%arg0: i32, %arg1: i32) -> (i32, i32, i32) {
    %c0_i32 = arith.constant 0 : i32
    %c0_i32_0 = arith.constant 0 : i32
    %c0_i32_1 = arith.constant 0 : i32
    return %arg1, %c0_i32, %c0_i32_0 : i32, i32, i32
  }
  func.func @transform_6(%arg0: i32, %arg1: i32) -> (i32, i32, i32) {
    %c0_i32 = arith.constant 0 : i32
    %c0_i32_0 = arith.constant 0 : i32
    %c0_i32_1 = arith.constant 0 : i32
    return %arg1, %c0_i32, %c0_i32_0 : i32, i32, i32
  }
  func.func @transform_7(%arg0: i32, %arg1: i32) -> (i32, i32, i32) {
    %c0_i32 = arith.constant 0 : i32
    %c0_i32_0 = arith.constant 0 : i32
    %c0_i32_1 = arith.constant 0 : i32
    return %arg0, %c0_i32, %c0_i32_0 : i32, i32, i32
  }
}

</mosaic_0001>

<bundles_post_ra>
// kernel: clip_vision_tower_forward.1
= control target key start
LH: loop header
LB: loop body
LE: loop exit
PB: predicated region body
PF: predicated region fallthrough
CT: control target
= control target key end

     0   :  { %s1996_s24 = smov 0   ;;  %s1998_s25 = smov 0   ;;  %s2306_s0 = inlined_call_operand.vmem [shape: bf16[2,16,192], index: 0, kind: input, shape index: {}]   ;;  %s2307_s1 = inlined_call_operand.vmem [shape: bf16[192,32], index: 1, kind: input, shape index: {}]   ;;  %s2308_s2 = inlined_call_operand.vmem [shape: f32[16,32], index: 2, kind: input, shape index: {}]   ;;  %s2309_s3 = inlined_call_operand.vmem [shape: f32[2,32], index: 3, kind: input, shape index: {}]   ;;  %s2310_s4 = inlined_call_operand.vmem [shape: bf16[1,32,256], index: 4, kind: input, shape index: {}]   ;;  %s2311_s5 = inlined_call_operand.vmem [shape: bf16[1,128,32], index: 5, kind: input, shape index: {}]   ;;  %s2312_s6 = inlined_call_operand.vmem [shape: f32[1,8,128], index: 6, kind: input, shape index: {}]   ;;  %s2313_s7 = inlined_call_operand.vmem [shape: f32[2,16,32], index: 7, kind: output, shape index: {}]  }
   0x1   :  { %s2000_s26 = smov 0  }
   0x2 LB: > { %s29_s27 = sadd.s32 1, %s1931_s25  ;;  %p1597_p0 = scmp.ge.s32.totalorder %s1935_s26, 1  ;;  %s1935_s26 = sphi %s2000_s26, %s17_s26   ;;  %s1931_s25 = sphi %s1998_s25, %s2315_s25   ;;  %s1927_s24 = sphi %s1996_s24, %s2314_s24  }
   0x3   : > { %p31_p1 = scmp.ge.s32.totalorder %s29_s27, 2  ;;  %p278_p2 = scmp.lt.s32.totalorder %s1935_s26, 3 }
   0x5   : > { %s2317_s27 = smov (%p31_p1, %s29_s27), 0  ;;  %p279_p3 = pnand %p1597_p0, %p278_p2 }
   0x6   : > { %v1832_v0 = vld [vmem:[%s2307_s1] sm:$0xff] (!%p279_p3)   ;;  %v1937_v1 = vmov (!%p279_p3), 0   ;;  %p324_p4 = scmp.lt.s32.totalorder (!%p279_p3), %s1927_s24, 1  ;;  %v1833_v2 = vld [vmem:[%s2307_s1 + $0x8] sm:$0xff] (!%p279_p3)   ;;  %v1834_v3 = vld [vmem:[%s2307_s1 + $0x10] sm:$0xff] (!%p279_p3)   ;;  %vm462_vm0 = vcmask (!%p279_p3), 523264  }
   0x7   : > { %282 = sbr.rel (%p279_p3) target bundleno = 4214 (0x1076), region = 48  ;;  %466 = vmatprep.subr.bf16.mxu0 (!%p279_p3), %v1937_v1  ;;  %v1835_v4 = vld [vmem:[%s2307_s1 + $0x18] sm:$0xff] (!%p279_p3)   ;;  %v1836_v5 = vld [vmem:[%s2307_s1 + $0x20] sm:$0xff] (!%p279_p3)   ;;  %v1837_v7 = vld [vmem:[%s2307_s1 + $0x28] sm:$0xff] (!%p279_p3)   ;;  %vm509_vm1 = vcmask (!%p279_p3), 261120   ;;  %vm1939_vm2 = vmmov (!%p279_p3), 0  }
   0x8   : > { %467 = vmatpush1.bf16.msra.mxu0 (!%p279_p3), %v1832_v0  ;;  %v1838_v8 = vld [vmem:[%s2307_s1 + $0x30] sm:$0xff] (!%p279_p3)   ;;  %v1839_v9 = vld [vmem:[%s2307_s1 + $0x38] sm:$0xff] (!%p279_p3)   ;;  %v1840_v10 = vld [vmem:[%s2307_s1 + $0x40] sm:$0xff] (!%p279_p3)   ;;  %s1940_s10 = smov (!%p279_p3), 96   ;;  %s1941_s12 = smov (!%p279_p3), 88   ;;  %vm695_vm3 = vcmask (!%p279_p3), 64512  }
   0x9   : > { %468 = vmatprep.subr.bf16.mxu0 (!%p279_p3), %v1937_v1  ;;  %v1841_v11 = vld [vmem:[%s2307_s1 + $0x48] sm:$0xff] (!%p279_p3)   ;;  %v1842_v12 = vld [vmem:[%s2307_s1 + $0x50] sm:$0xff] (!%p279_p3)   ;;  %v1843_v13 = vld [vmem:[%s2307_s1 + $0x58] sm:$0xff] (!%p279_p3)   ;;  %s1942_s13 = smov (!%p279_p3), 120   ;;  %vm743_vm9 = vcmask (!%p279_p3), 130048   ;;  %s1944_s14 = smov (!%p279_p3), 64  }
   0xa   : > { %v379_v15 = vld [vmem:[%s2308_s2] sm:$0xff] (!%p279_p3)  ;;  %v380_v17 = vld [vmem:[%s2308_s2 + $0x8] sm:$0xff] (!%p279_p3)  ;;  %s1945_s15 = smov (!%p279_p3), 80   ;;  %s1946_s17 = smov (!%p279_p3), 112   ;;  %vm1205_vm10 = vcmask (!%p279_p3), 195584  }
   0xb   : > { %v1617_v42 = vld [vmem:[%s2309_s3] ss:$0 sm:$0xff] (!%p279_p3)  ;;  %v1618_v44 = vld [vmem:[%s2309_s3 + $0x1] ss:$0 sm:$0xff] (!%p279_p3)  ;;  %s1947_s18 = smov (!%p279_p3), 72   ;;  %s1948_s19 = smov (!%p279_p3), 56  }
   0xc   : > { %469 = vmatpush1.bf16.msra.mxu0 (!%p279_p3), %v1833_v2  ;;  %v1938_v2 = vmov (!%p279_p3), 0.0   ;;  %s1950_s20 = smov (!%p279_p3), 48   ;;  %s1951_s21 = smov (!%p279_p3), 32  }
   0xd   : > { %470 = vmatprep.subr.bf16.mxu0 (!%p279_p3), %v1937_v1  ;;  %1690 = vmatprep.subr.bf16.mxu1 (!%p279_p3), %v1938_v2  ;;  %s1952_s22 = smov (!%p279_p3), 8   ;;  %s1953_s23 = smov (!%p279_p3), 40  }
   0xe   : > { %s2319_s24 = smov (!%p324_p4, %s1927_s24), 1  ;;  %1692 = vmatprep.mubr.msk.bf16.mxu1 %vm1939_vm2, %v1938_v2  ;;  %s1954_s28 = smov 16  }
   0xf   : > { %s1646_s11 = sshll.u32 %s2319_s24, 4  ;;  %s1955_s29 = smov 24  }
  0x10   : > { %471 = vmatpush1.bf16.msra.mxu0 %v1834_v3  ;;  %s328_s16 = scalar_lea.vmem %s2306_s0, %s1646_s11  ;;  %v2100_v3 = vld [vmem:[%s2310_s4 + $0x10] ss:$8 sps:$4 sm:$0xff]  }
  0x11   : > { %472 = vmatprep.subr.bf16.mxu0 %v1937_v1  ;;  %v1846_v6 = vld [vmem:[%s328_s16 + $0x4] ss:$8 sps:$4 sm:$0xff]   ;;  %v1844_v14 = vld [vmem:[%s328_s16] ss:$8 sps:$4 sm:$0xff]   ;;  %s1949_s16 = smov 104  }
  0x12   : > { %1616 = vmatprep.mubr.msk.bf16.mxu0 %vm462_vm0, %v1846_v6 }
  0x14   : > { %473 = vmatpush1.bf16.msra.mxu0 %v1835_v4 }
  0x15   : > { %474 = vmatprep.subr.bf16.mxu0 %v1937_v1 }
  0x18   : > { %475 = vmatpush1.bf16.msra.mxu0 %v1836_v5 }
  0x19   : > { %476 = vmatprep.subr.bf16.mxu0 %v1937_v1 }
  0x1c   : > { %477 = vmatpush1.bf16.msra.mxu0 %v1837_v7  ;;  %v574_v7 = vlaneseq }
  0x1d   : > { %478 = vmatprep.subr.bf16.mxu0 %v1937_v1 }
  0x20   : > { %479 = vmatpush1.bf16.msra.mxu0 %v1838_v8 }
  0x21   : > { %480 = vmatprep.subr.bf16.mxu0 %v1937_v1 }
  0x24   : > { %481 = vmatpush1.bf16.msra.mxu0 %v1839_v9 }
  0x25   : > { %482 = vmatprep.subr.bf16.mxu0 %v1937_v1 }
  0x28   : > { %483 = vmatpush1.bf16.msra.mxu0 %v1840_v10 }
  0x29   : > { %484 = vmatprep.subr.bf16.mxu0 %v1937_v1 }
  0x2c   : > { %485 = vmatpush1.bf16.msra.mxu0 %v1841_v11  ;;  %v2108_v11 = vshrl.u32 %v574_v7, 7 }
  0x2d   : > { %486 = vmatprep.subr.bf16.mxu0 %v1937_v1 }
  0x30   : > { %487 = vmatpush1.bf16.msra.mxu0 %v1842_v12  ;;  %v620_v12 = vsub.s32 0, %v2108_v11 }
  0x31   : > { %488 = vmatprep.subr.bf16.mxu0 %v1937_v1  ;;  %v2091_v1 = vld [vmem:[%s2310_s4] ss:$8 sps:$4 sm:$0xff]  }
  0x34   : > { %489 = vmatpush1.bf16.msra.mxu0 %v1843_v13  ;;  %v2114_v13 = vld [vmem:[%s2312_s6] sm:$0xff] }
  0x35   : > { %1682 = vmatprep.subr.bf16.mxu0 %v1938_v2 }
  0x37   : > { %499 = vmatmul.mubr.bf16.vlgmr.msra.gmra.mrb[0].mxu0 %v1844_v14 }
  0x38   : > { %1683 = vmatpush3.bf16.msra.mxu0 %v2091_v1  ;;  %1686 = vmatprep.mubr.msk.bf16.mxu0 %vm1939_vm2, %v1938_v2 }
  0x39   : > { %1684 = vmatprep.subr.bf16.mxu0 %v1938_v2 }
  0x3c   : > { %1685 = vmatpush3.bf16.msra.mxu0 %v2100_v3 }
  0x3d   : > { %1720 = vmatprep.subr.bf16.mxu0 %v1938_v2 }
 0x10a   : > { %v500_v16 = vpop.f32.mrb[0].mxu0 }
 0x10b   : > { %v501_v18 = vadd.f32 %v500_v16, %v379_v15  ;;  %v502_v19 = vpop.f32.mrb[1].mxu0  ;;  %v621_v15 = vrot.slane %v2114_v13, %v620_v12 }
 0x10c   : > { %v503_v20 = vpop.f32.mrb[2].mxu0 }
 0x10d   : > { %v504_v21 = vadd.f32 %v503_v20, %v380_v17  ;;  %v505_v22 = vpop.f32.mrb[3].mxu0  ;;  %v510_v23 = vsel %vm509_vm1, %v501_v18, 0.0  ;;  %v626_v17 = vsub.s32 1, %v2108_v11 }
 0x10e   : > { %511 = vadd.xlane.f32.xlu0 %v510_v23 }
 0x10f   : > { %v513_v24 = vsel %vm509_vm1, %v504_v21, 0.0 }
 0x112   : > { %514 = vadd.xlane.f32.xlu0 %v513_v24 }
 0x19b   : > { %v512_v25 = vpop.xlane.xlu0 %511 }
 0x19c   : > { %v517_v26 = vmul.f32 0.03125, %v512_v25 }
 0x19e   : > { %v519_v27 = vsub.f32 %v501_v18, %v517_v26  ;;  %v633_v26 = vsub.s32 2, %v2108_v11 }
 0x19f   : > { %v515_v28 = vpop.xlane.xlu0 %514 }
 0x1a0   : > { %v518_v29 = vmul.f32 0.03125, %v515_v28  ;;  %v521_v30 = vmul.f32 %v519_v27, %v519_v27 }
 0x1a2   : > { %v520_v31 = vsub.f32 %v504_v21, %v518_v29  ;;  %v523_v32 = vsel %vm509_vm1, %v521_v30, 0.0  ;;  %v627_v21 = vrot.slane %v2114_v13, %v626_v17 }
 0x1a3   : > { %524 = vadd.xlane.f32.xlu1 %v523_v32 }
 0x1a4   : > { %v522_v33 = vmul.f32 %v520_v31, %v520_v31 }
 0x1a6   : > { %v526_v34 = vsel %vm509_vm1, %v522_v33, 0.0 }
 0x1a7   : > { %527 = vadd.xlane.f32.xlu1 %v526_v34 }
 0x230   : > { %v525_v35 = vpop.xlane.xlu1 %524 }
 0x231   : > { %v529_v36 = vmul.f32 0.03125, %v525_v35 }
 0x233   : > { %v531_v37 = vadd.f32 1e-05, %v529_v36 }
 0x234   : > { %v528_v38 = vpop.xlane.xlu1 %527 }
 0x235   : > { %1861 = vrsqrt.f32 %v531_v37  ;;  %v530_v39 = vmul.f32 0.03125, %v528_v38  ;;  %v578_v37 = vand.u32 127, %v574_v7  ;;  %v576_v38 = vadd.s32 8, %v2108_v11 }
 0x237   : > { %v532_v40 = vadd.f32 1e-05, %v530_v39  ;;  %v579_v39 = vshrl.u32 %v2108_v11, 3 }
 0x239   : > { %1863 = vrsqrt.f32 %v532_v40  ;;  %v581_v40 = vshrl.u32 %v578_v37, 3 }
 0x23b   : > { %vm582_vm4 = vcmp.eq.s32.totalorder %v579_v39, %v581_v40 }
 0x23f   : > { %v1862_v41 = vpop.eup %1861 }
 0x240   : > { %v535_v43 = vmul.f32 %v1862_v41, %v519_v27  ;;  %v634_v27 = vrot.slane %v2114_v13, %v633_v26  ;;  %v584_v41 = vand.u32 7, %v578_v37 }
 0x242   : > { %v541_v45 = vmul.f32 %v1617_v42, %v535_v43  ;;  %vm585_vm5 = vcmp.lt.s32.totalorder %v584_v41, 5  ;;  %v1943_v43 = vmov -1e+30  }
 0x243   : > { %v1864_v46 = vpop.eup %1863  ;;  %vm586_vm7 = vmand %vm582_vm4, %vm585_vm5 }
 0x244   : > { %v547_v47 = vadd.f32 %v1618_v44, %v541_v45  ;;  %v536_v48 = vmul.f32 %v1864_v46, %v520_v31 }
 0x246   : > { %549 = vst.msk [vmem:[#allocation2] sm:$0xff] %vm509_vm1, %v547_v47  ;;  %v542_v49 = vmul.f32 %v1617_v42, %v536_v48  ;;  %v580_v42 = vshrl.u32 %v576_v38, 3 }
 0x248   : > { %v548_v50 = vadd.f32 %v1618_v44, %v542_v49  ;;  %vm583_vm6 = vcmp.eq.s32.totalorder %v580_v42, %v581_v40  ;;  %v2137_v44 = vsel %vm586_vm7, 0.0, %v1943_v43 }
 0x249   : > { %vm587_vm8 = vmand %vm583_vm6, %vm585_vm5 }
 0x24a   : > { %550 = vst.msk [vmem:[#allocation2 + $0x8] sm:$0xff] %vm509_vm1, %v548_v50  ;;  %v2139_v46 = vsel %vm587_vm8, 0.0, %v1943_v43 }
 0x24d   : > { %v2076_v51 = vld [vmem:[#allocation2] sm:$0xff] }
 0x24e   : > { %v591_v52 = vsel %vm509_vm1, %v2076_v51, 0.0 }
 0x24f   : > { %592 = vadd.xlane.f32.xlu0 %v591_v52 }
 0x251   : > { %v2080_v53 = vld [vmem:[#allocation2 + $0x8] sm:$0xff] }
 0x252   : > { %v594_v54 = vsel %vm509_vm1, %v2080_v53, 0.0 }
 0x253   : > { %595 = vadd.xlane.f32.xlu1 %v594_v54 }
 0x2dc   : > { %v593_v55 = vpop.xlane.xlu0 %592 }
 0x2dd   : > { %v598_v56 = vmul.f32 0.03125, %v593_v55 }
 0x2df   : > { %v600_v57 = vsub.f32 %v2076_v51, %v598_v56 }
 0x2e0   : > { %v596_v58 = vpop.xlane.xlu1 %595 }
 0x2e1   : > { %v599_v59 = vmul.f32 0.03125, %v596_v58  ;;  %v602_v60 = vmul.f32 %v600_v57, %v600_v57 }
 0x2e3   : > { %v601_v61 = vsub.f32 %v2080_v53, %v599_v59  ;;  %v604_v62 = vsel %vm509_vm1, %v602_v60, 0.0 }
 0x2e4   : > { %605 = vadd.xlane.f32.xlu0 %v604_v62 }
 0x2e5   : > { %v603_v63 = vmul.f32 %v601_v61, %v601_v61 }
 0x2e7   : > { %v607_v0 = vsel %vm509_vm1, %v603_v63, 0.0 }
 0x2e8   : > { %608 = vadd.xlane.f32.xlu1 %v607_v0 }
 0x371   : > { %v606_v4 = vpop.xlane.xlu0 %605 }
 0x372   : > { %v610_v5 = vmul.f32 0.03125, %v606_v4 }
 0x374   : > { %v612_v6 = vadd.f32 1e-05, %v610_v5 }
 0x375   : > { %v609_v8 = vpop.xlane.xlu1 %608 }
 0x376   : > { %1865 = vrsqrt.f32 %v612_v6  ;;  %v611_v9 = vmul.f32 0.03125, %v609_v8 }
 0x378   : > { %v613_v10 = vadd.f32 1e-05, %v611_v9 }
 0x37a   : > { %1867 = vrsqrt.f32 %v613_v10 }
 0x380   : > { %v1866_v14 = vpop.eup %1865 }
 0x381   : > { %v616_v16 = vmul.f32 %v1866_v14, %v600_v57 }
 0x383   : > { %v622_v19 = vmul.f32 %v621_v15, %v616_v16 }
 0x384   : > { %v1868_v18 = vpop.eup %1867 }
 0x385   : > { %v617_v20 = vmul.f32 %v1868_v18, %v601_v61  ;;  %v628_v23 = vadd.f32 %v627_v21, %v622_v19 }
 0x387   : > { %v623_v22 = vmul.f32 %v621_v15, %v617_v20 }
 0x389   : > { %v629_v24 = vadd.f32 %v627_v21, %v623_v22 }
 0x38b   : > { %v630_v25 = vpack.c.bf16 %v629_v24, %v628_v23 }
 0x38d   : > { %1687 = vmatmul.mubr.msk.bf16.vlgmr.msra.gmra.mrb[4].mxu0 %vm509_vm1, %v630_v25 }
 0x38e   : > { %1722 = vmatprep.mubr.msk.bf16.mxu0 %vm1939_vm2, %v1938_v2 }
 0x460   : > { %v684_v28 = vpop.f32.mrb[4].mxu0 }
 0x461   : > { %v1688_v29 = vpop.f32.mrb[5].mxu0  ;;  %v685_v31 = vadd.f32 %v684_v28, %v634_v27 }
 0x462   : > { %v687_v30 = vpop.f32.mrb[6].mxu0 }
 0x463   : > { %v688_v32 = vadd.f32 %v687_v30, %v634_v27  ;;  %v1689_v33 = vpop.f32.mrb[7].mxu0 }
 0x465   : > { %v2124_v34 = vpack.c.bf16 %v688_v32, %v685_v31 }
 0x467   : > { %693 = vrot.lane.b32.xlu0 %v2124_v34, %s1940_s10 }
 0x46b   : > { %816 = vrot.lane.b32.xlu0 %v2124_v34, %s1941_s12  ;;  %s347_s12 = scalar_lea.vmem %s2313_s7, %s1646_s11 }
 0x46f   : > { %814 = vrot.lane.b32.xlu0 %v2124_v34, %s1942_s13 }
 0x4d9   : > { %v694_v35 = vpop.permute.xlu0 %693 }
 0x4da   : > { %v700_v36 = vsel %vm695_vm3, %v694_v35, 0 }
 0x4db   : > { %1691 = vmatpush3.bf16.xpose.msra.mxu1 %v700_v36 }
 0x4dc   : > { %1696 = vmatprep.subr.bf16.mxu1 %v1938_v2 }
 0x4dd   : > { %v817_v14 = vpop.permute.xlu0 %816 }
 0x4de   : > { %v822_v16 = vsel %vm695_vm3, %v817_v14, 0 }
 0x4e1   : > { %v815_v17 = vpop.permute.xlu0 %814 }
 0x4e2   : > { %1693 = vmatmul.mubr.msk.bf16.vlgmr.msra.gmra.mrb[0].mxu1 %vm695_vm3, %v2124_v34 }
 0x4e3   : > { %1698 = vmatprep.mubr.msk.bf16.mxu1 %vm1939_vm2, %v1938_v2 }
 0x5b5   : > { %v736_v45 = vpop.f32.mrb[0].mxu1 }
 0x5b6   : > { %v737_v47 = vadd.f32 %v736_v45, %v2137_v44  ;;  %v1694_v48 = vpop.f32.mrb[1].mxu1 }
 0x5b7   : > { %v739_v49 = vpop.f32.mrb[2].mxu1 }
 0x5b8   : > { %v740_v50 = vadd.f32 %v739_v49, %v2139_v46  ;;  %v1695_v52 = vpop.f32.mrb[3].mxu1  ;;  %v744_v54 = vsel %vm743_vm9, %v737_v47, -inf }
 0x5b9   : > { %745 = vmax.xlane.f32.xlu1 %v744_v54 }
 0x5ba   : > { %v747_v55 = vsel %vm743_vm9, %v740_v50, -inf }
 0x5bd   : > { %748 = vmax.xlane.f32.xlu1 %v747_v55 }
 0x646   : > { %v746_v56 = vpop.xlane.xlu1 %745 }
 0x647   : > { %v750_v57 = vsub.f32 %v737_v47, %v746_v56 }
 0x649   : > { %v752_v58 = vmul.f32 1.442695, %v750_v57 }
 0x64a   : > { %v749_v59 = vpop.xlane.xlu1 %748 }
 0x64b   : > { %1869 = vpow2.f32 %v752_v58  ;;  %v751_v60 = vsub.f32 %v740_v50, %v749_v59 }
 0x64d   : > { %v754_v61 = vmul.f32 1.442695, %v751_v60 }
 0x64f   : > { %1871 = vpow2.f32 %v754_v61 }
 0x655   : > { %v1870_v62 = vpop.eup %1869 }
 0x656   : > { %v756_v63 = vsel %vm743_vm9, %v1870_v62, 0.0 }
 0x657   : > { %757 = vadd.xlane.f32.xlu1 %v756_v63 }
 0x659   : > { %v1872_v0 = vpop.eup %1871 }
 0x65a   : > { %v759_v4 = vsel %vm743_vm9, %v1872_v0, 0.0 }
 0x65b   : > { %760 = vadd.xlane.f32.xlu1 %v759_v4 }
 0x66c   : > { %767 = vrot.lane.b32.xlu1 %v2124_v34, %s1944_s14 }
 0x6e4   : > { %v758_v5 = vpop.xlane.xlu1 %757 }
 0x6e5   : > { %1873 = vrcp.f32 %v758_v5 }
 0x6e8   : > { %v761_v6 = vpop.xlane.xlu1 %760 }
 0x6e9   : > { %1875 = vrcp.f32 %v761_v6 }
 0x6ec   : > { %v768_v7 = vpop.permute.xlu1 %767 }
 0x6ed   : > { %1697 = vmatpush3.bf16.msra.mxu1 %v768_v7 }
 0x6ee   : > { %1702 = vmatprep.subr.bf16.mxu1 %v1938_v2 }
 0x6ef   : > { %v1874_v8 = vpop.eup %1873 }
 0x6f0   : > { %v764_v10 = vmul.f32 %v1874_v8, %v1870_v62 }
 0x6f3   : > { %v1876_v9 = vpop.eup %1875 }
 0x6f4   : > { %v765_v12 = vmul.f32 %v1876_v9, %v1872_v0 }
 0x6f6   : > { %v766_v15 = vpack.c.bf16 %v765_v12, %v764_v10 }
 0x6f8   : > { %1699 = vmatmul.mubr.msk.bf16.vlgmr.msra.gmra.mrb[4].mxu1 %vm743_vm9, %v766_v15 }
 0x6f9   : > { %1703 = vmatpush3.bf16.xpose.msra.mxu1 %v822_v16  ;;  %1704 = vmatprep.mubr.msk.bf16.mxu1 %vm1939_vm2, %v1938_v2 }
 0x6fa   : > { %1708 = vmatprep.subr.bf16.mxu1 %v1938_v2 }
 0x700   : > { %1705 = vmatmul.mubr.msk.bf16.vlgmr.msra.gmra.mrb[8].mxu1 %vm695_vm3, %v815_v17 }
 0x701   : > { %1710 = vmatprep.mubr.msk.bf16.mxu1 %vm1939_vm2, %v1938_v2 }
 0x7cb   : > { %v2157_v18 = vpop.f32.mrb[4].mxu1 }
 0x7cc   : > { %v1700_v19 = vpop.f32.mrb[5].mxu1 }
 0x7cd   : > { %v2159_v20 = vpop.f32.mrb[6].mxu1 }
 0x7ce   : > { %v1701_v21 = vpop.f32.mrb[7].mxu1 }
 0x7d3   : > { %v858_v22 = vpop.f32.mrb[8].mxu1 }
 0x7d4   : > { %v859_v23 = vadd.f32 %v858_v22, %v2137_v44  ;;  %v1706_v24 = vpop.f32.mrb[9].mxu1 }
 0x7d5   : > { %v861_v25 = vpop.f32.mrb[10].mxu1 }
 0x7d6   : > { %v862_v26 = vadd.f32 %v861_v25, %v2139_v46  ;;  %v1707_v27 = vpop.f32.mrb[11].mxu1  ;;  %v865_v28 = vsel %vm743_vm9, %v859_v23, -inf }
 0x7d7   : > { %866 = vmax.xlane.f32.xlu0 %v865_v28 }
 0x7d8   : > { %v868_v29 = vsel %vm743_vm9, %v862_v26, -inf }
 0x7d9   : > { %869 = vmax.xlane.f32.xlu1 %v868_v29 }
 0x7ea   : > { %937 = vrot.lane.b32.xlu1 %v2124_v34, %s1945_s15 }
 0x7ee   : > { %935 = vrot.lane.b32.xlu1 %v2124_v34, %s1946_s17 }
 0x7f2   : > { %1058 = vrot.lane.b32.xlu1 %v2124_v34, %s1947_s18 }
 0x864   : > { %v867_v30 = vpop.xlane.xlu0 %866 }
 0x865   : > { %v871_v31 = vsub.f32 %v859_v23, %v867_v30 }
 0x866   : > { %v870_v32 = vpop.xlane.xlu1 %869 }
 0x867   : > { %v873_v33 = vmul.f32 1.442695, %v871_v31  ;;  %v872_v35 = vsub.f32 %v862_v26, %v870_v32 }
 0x869   : > { %1877 = vpow2.f32 %v873_v33  ;;  %v875_v36 = vmul.f32 1.442695, %v872_v35 }
 0x86a   : > { %v938_v47 = vpop.permute.xlu1 %937 }
 0x86b   : > { %1879 = vpow2.f32 %v875_v36  ;;  %v943_v55 = vsel %vm695_vm3, %v938_v47, 0 }
 0x86e   : > { %v936_v54 = vpop.permute.xlu1 %935 }
 0x872   : > { %v1059_v56 = vpop.permute.xlu1 %1058 }
 0x873   : > { %v1878_v37 = vpop.eup %1877  ;;  %v1064_v57 = vsel %vm695_vm3, %v1059_v56, 0 }
 0x874   : > { %v877_v38 = vsel %vm743_vm9, %v1878_v37, 0.0 }
 0x875   : > { %v1880_v39 = vpop.eup %1879  ;;  %878 = vadd.xlane.f32.xlu0 %v877_v38 }
 0x876   : > { %v880_v40 = vsel %vm743_vm9, %v1880_v39, 0.0 }
 0x879   : > { %881 = vadd.xlane.f32.xlu0 %v880_v40 }
 0x88f   : > { %888 = vrot.lane.b32.xlu0 %v2124_v34, %s1948_s19 }
 0x893   : > { %1056 = vrot.lane.b32.xlu0 %v2124_v34, %s1949_s16 }
 0x902   : > { %v879_v41 = vpop.xlane.xlu0 %878 }
 0x903   : > { %1881 = vrcp.f32 %v879_v41 }
 0x906   : > { %v882_v42 = vpop.xlane.xlu0 %881 }
 0x907   : > { %1883 = vrcp.f32 %v882_v42 }
 0x90a   : > { %v889_v43 = vpop.permute.xlu0 %888 }
 0x90b   : > { %1709 = vmatpush3.bf16.msra.mxu1 %v889_v43 }
 0x90c   : > { %1714 = vmatprep.subr.bf16.mxu1 %v1938_v2 }
 0x90d   : > { %v1882_v45 = vpop.eup %1881 }
 0x90e   : > { %v885_v49 = vmul.f32 %v1882_v45, %v1878_v37  ;;  %v1057_v58 = vpop.permute.xlu0 %1056 }
 0x911   : > { %v1884_v48 = vpop.eup %1883 }
 0x912   : > { %v886_v50 = vmul.f32 %v1884_v48, %v1880_v39 }
 0x914   : > { %v887_v52 = vpack.c.bf16 %v886_v50, %v885_v49 }
 0x916   : > { %1711 = vmatmul.mubr.msk.bf16.vlgmr.msra.gmra.mrb[12].mxu1 %vm743_vm9, %v887_v52 }
 0x917   : > { %1715 = vmatpush3.bf16.xpose.msra.mxu1 %v943_v55  ;;  %1716 = vmatprep.mubr.msk.bf16.mxu1 %vm1939_vm2, %v1938_v2 }
 0x918   : > { %1726 = vmatprep.subr.bf16.mxu1 %v1938_v2 }
 0x91e   : > { %1717 = vmatmul.mubr.msk.bf16.vlgmr.msra.gmra.mrb[16].mxu1 %vm695_vm3, %v936_v54 }
 0x91f   : > { %1727 = vmatpush3.bf16.xpose.msra.mxu1 %v1064_v57  ;;  %1728 = vmatprep.mubr.msk.bf16.mxu1 %vm1939_vm2, %v1938_v2 }
 0x920   : > { %1738 = vmatprep.subr.bf16.mxu1 %v1938_v2 }
 0x926   : > { %1729 = vmatmul.mubr.msk.bf16.vlgmr.msra.gmra.mrb[20].mxu1 %vm695_vm3, %v1057_v58 }
 0x927   : > { %1742 = vmatprep.mubr.msk.bf16.mxu1 %vm1939_vm2, %v1938_v2 }
 0x9e9   : > { %v928_v59 = vpop.f32.mrb[12].mxu1 }
 0x9ea   : > { %v1712_v60 = vpop.f32.mrb[13].mxu1 }
 0x9eb   : > { %v931_v61 = vpop.f32.mrb[14].mxu1 }
 0x9ec   : > { %v1817_v62 = vpack.i.bf16 %v931_v61, %v928_v59  ;;  %v1713_v63 = vpop.f32.mrb[15].mxu1 }
 0x9f1   : > { %v979_v0 = vpop.f32.mrb[16].mxu1 }
 0x9f2   : > { %v980_v4 = vadd.f32 %v979_v0, %v2137_v44  ;;  %v1718_v5 = vpop.f32.mrb[17].mxu1 }
 0x9f3   : > { %v982_v6 = vpop.f32.mrb[18].mxu1 }
 0x9f4   : > { %v983_v7 = vadd.f32 %v982_v6, %v2139_v46  ;;  %v1719_v8 = vpop.f32.mrb[19].mxu1  ;;  %v986_v9 = vsel %vm743_vm9, %v980_v4, -inf }
 0x9f5   : > { %987 = vmax.xlane.f32.xlu1 %v986_v9 }
 0x9f6   : > { %v989_v10 = vsel %vm743_vm9, %v983_v7, -inf }
 0x9f7   : > { %990 = vmax.xlane.f32.xlu0 %v989_v10 }
 0x9f9   : > { %v1100_v12 = vpop.f32.mrb[20].mxu1 }
 0x9fa   : > { %v1101_v14 = vadd.f32 %v1100_v12, %v2137_v44  ;;  %v1730_v15 = vpop.f32.mrb[21].mxu1 }
 0x9fb   : > { %v1103_v16 = vpop.f32.mrb[22].mxu1 }
 0x9fc   : > { %v1104_v17 = vadd.f32 %v1103_v16, %v2139_v46  ;;  %v1731_v19 = vpop.f32.mrb[23].mxu1  ;;  %v1107_v21 = vsel %vm743_vm9, %v1101_v14, -inf }
 0x9fd   : > { %1108 = vmax.xlane.f32.xlu0 %v1107_v21 }
 0x9fe   : > { %v1110_v22 = vsel %vm743_vm9, %v1104_v17, -inf }
 0xa01   : > { %1111 = vmax.xlane.f32.xlu0 %v1110_v22 }
 0xa82   : > { %v988_v23 = vpop.xlane.xlu1 %987 }
 0xa83   : > { %v992_v24 = vsub.f32 %v980_v4, %v988_v23 }
 0xa84   : > { %v991_v25 = vpop.xlane.xlu0 %990 }
 0xa85   : > { %v994_v26 = vmul.f32 1.442695, %v992_v24  ;;  %v993_v27 = vsub.f32 %v983_v7, %v991_v25 }
 0xa87   : > { %1885 = vpow2.f32 %v994_v26  ;;  %v996_v28 = vmul.f32 1.442695, %v993_v27 }
 0xa89   : > { %1887 = vpow2.f32 %v996_v28 }
 0xa8a   : > { %v1109_v44 = vpop.xlane.xlu0 %1108 }
 0xa8b   : > { %v1113_v29 = vsub.f32 %v1101_v14, %v1109_v44 }
 0xa8d   : > { %v1115_v30 = vmul.f32 1.442695, %v1113_v29  ;;  %v1211_v29 = vsub.s32 3, %v2108_v11 }
 0xa8e   : > { %v1112_v31 = vpop.xlane.xlu0 %1111 }
 0xa8f   : > { %1889 = vpow2.f32 %v1115_v30  ;;  %v1114_v46 = vsub.f32 %v1104_v17, %v1112_v31 }
 0xa91   : > { %v1886_v32 = vpop.eup %1885  ;;  %v1117_v33 = vmul.f32 1.442695, %v1114_v46 }
 0xa92   : > { %v998_v35 = vsel %vm743_vm9, %v1886_v32, 0.0 }
 0xa93   : > { %v1888_v36 = vpop.eup %1887  ;;  %1891 = vpow2.f32 %v1117_v33  ;;  %999 = vadd.xlane.f32.xlu1 %v998_v35 }
 0xa94   : > { %v1001_v37 = vsel %vm743_vm9, %v1888_v36, 0.0 }
 0xa95   : > { %1002 = vadd.xlane.f32.xlu0 %v1001_v37 }
 0xa99   : > { %v1890_v38 = vpop.eup %1889 }
 0xa9a   : > { %v1119_v39 = vsel %vm743_vm9, %v1890_v38, 0.0 }
 0xa9b   : > { %1120 = vadd.xlane.f32.xlu1 %v1119_v39 }
 0xa9d   : > { %v1892_v40 = vpop.eup %1891 }
 0xa9e   : > { %v1122_v41 = vsel %vm743_vm9, %v1892_v40, 0.0 }
 0xa9f   : > { %1123 = vadd.xlane.f32.xlu0 %v1122_v41 }
 0xaac   : > { %1009 = vrot.lane.b32.xlu1 %v2124_v34, %s1950_s20 }
 0xab0   : > { %1213 = vrot.lane.b32.xlu1 %v2091_v1, %s1951_s21 }
 0xab4   : > { %1818 = vrot.lane.b32.xlu1 %v1817_v62, %s1952_s22 }
 0xab5   : > { %1130 = vrot.lane.b32.xlu0 %v2124_v34, %s1953_s23 }
 0xb20   : > { %v1000_v42 = vpop.xlane.xlu1 %999 }
 0xb21   : > { %1893 = vrcp.f32 %v1000_v42 }
 0xb22   : > { %v1003_v43 = vpop.xlane.xlu0 %1002 }
 0xb23   : > { %1895 = vrcp.f32 %v1003_v43 }
 0xb28   : > { %v1121_v45 = vpop.xlane.xlu1 %1120 }
 0xb29   : > { %1897 = vrcp.f32 %v1121_v45 }
 0xb2b   : > { %v1894_v47 = vpop.eup %1893 }
 0xb2c   : > { %v1010_v48 = vpop.permute.xlu1 %1009  ;;  %v1124_v49 = vpop.xlane.xlu0 %1123  ;;  %v1006_v52 = vmul.f32 %v1894_v47, %v1886_v32 }
 0xb2d   : > { %v1896_v50 = vpop.eup %1895  ;;  %1899 = vrcp.f32 %v1124_v49  ;;  %1721 = vmatpush3.bf16.msra.mxu0 %v1010_v48  ;;  %v1851_v49 = vld [vmem:[%s2310_s4 + $0x4] ss:$8 sps:$4 sm:$0xff]  }
 0xb2e   : > { %v1007_v54 = vmul.f32 %v1896_v50, %v1888_v36  ;;  %1732 = vmatprep.subr.bf16.mxu0 %v1938_v2  ;;  %v1852_v50 = vld [vmem:[%s2310_s4 + $0x14] ss:$8 sps:$4 sm:$0xff]  }
 0xb30   : > { %v1214_v1 = vpop.permute.xlu1 %1213  ;;  %v1131_v55 = vpop.permute.xlu0 %1130  ;;  %v1008_v56 = vpack.c.bf16 %v1007_v54, %v1006_v52 }
 0xb31   : > { %1739 = vmatpush3.bf16.msra.mxu1 %v1214_v1 }
 0xb32   : > { %1723 = vmatmul.mubr.msk.bf16.vlgmr.msra.gmra.mrb[8].mxu0 %vm743_vm9, %v1008_v56  ;;  %1740 = vmatprep.subr.bf16.mxu1 %v1938_v2 }
 0xb33   : > { %1733 = vmatpush3.bf16.msra.mxu0 %v1131_v55  ;;  %1734 = vmatprep.mubr.msk.bf16.mxu0 %vm1939_vm2, %v1938_v2  ;;  %v1898_v34 = vpop.eup %1897 }
 0xb34   : > { %1746 = vmatprep.subr.bf16.mxu0 %v1938_v2  ;;  %v1127_v58 = vmul.f32 %v1898_v34, %v1890_v38  ;;  %v1819_v10 = vpop.permute.xlu1 %1818 }
 0xb35   : > { %v1821_v15 = vunpack.i.h.bf16 %v1819_v10  ;;  %v1820_v16 = vunpack.i.l.bf16 %v1819_v10  ;;  %v1854_v10 = vld [vmem:[%s2311_s5 + $0x8] sm:$0xff]  }
 0xb37   : > { %v1900_v57 = vpop.eup %1899  ;;  %v1201_v22 = vsel %vm695_vm3, %v2157_v18, %v1820_v16  ;;  %v1858_v16 = vld [vmem:[%s2311_s5 + $0x28] sm:$0xff]  }
 0xb38   : > { %v1128_v59 = vmul.f32 %v1900_v57, %v1892_v40  ;;  %v1293_v57 = vsub.s32 4, %v2108_v11 }
 0xb3a   : > { %v1129_v60 = vpack.c.bf16 %v1128_v59, %v1127_v58  ;;  %v1294_v59 = vrot.slane %v2114_v13, %v1293_v57 }
 0xb3c   : > { %1735 = vmatmul.mubr.msk.bf16.vlgmr.msra.gmra.mrb[12].mxu0 %vm743_vm9, %v1129_v60 }
 0xb3d   : > { %1750 = vmatprep.mubr.msk.bf16.mxu0 %vm1939_vm2, %v1938_v2  ;;  %1747 = vmatpush3.bf16.msra.mxu0 %v1851_v49 }
 0xb3e   : > { %1748 = vmatprep.subr.bf16.mxu0 %v1938_v2 }
 0xb41   : > { %1749 = vmatpush3.bf16.msra.mxu0 %v1852_v50 }
 0xc05   : > { %v1049_v61 = vpop.f32.mrb[8].mxu0 }
 0xc06   : > { %v1724_v62 = vpop.f32.mrb[9].mxu0 }
 0xc07   : > { %v1052_v63 = vpop.f32.mrb[10].mxu0 }
 0xc08   : > { %v1822_v0 = vpack.i.bf16 %v1052_v63, %v1049_v61  ;;  %v1725_v4 = vpop.f32.mrb[11].mxu0  ;;  %v1299_v61 = vsub.s32 5, %v2108_v11 }
 0xc0a   : > { %1823 = vrot.lane.b32.xlu1 %v1822_v0, %s1954_s28  ;;  %v1300_v4 = vrot.slane %v2114_v13, %v1299_v61 }
 0xc0e   : > { %1215 = vrot.lane.b32.xlu1 %v2100_v3, %s1951_s21  ;;  %v1202_v3 = vsel %vm695_vm3, %v2159_v20, %v1821_v15  ;;  %v1212_v20 = vrot.slane %v2114_v13, %v1211_v29  ;;  %v1857_v15 = vld [vmem:[%s2311_s5 + $0x20] sm:$0xff]  }
 0xc0f   : > { %v1170_v5 = vpop.f32.mrb[12].mxu0 }
 0xc10   : > { %v1736_v6 = vpop.f32.mrb[13].mxu0 }
 0xc11   : > { %v1173_v7 = vpop.f32.mrb[14].mxu0 }
 0xc12   : > { %v1827_v8 = vpack.i.bf16 %v1173_v7, %v1170_v5  ;;  %v1737_v9 = vpop.f32.mrb[15].mxu0 }
 0xc13   : > { %v1853_v9 = vld [vmem:[%s2311_s5] sm:$0xff]  }
 0xc14   : > { %1828 = vrot.lane.b32.xlu0 %v1827_v8, %s1955_s29 }
 0xc7c   : > { %v1824_v12 = vpop.permute.xlu1 %1823 }
 0xc7d   : > { %v1826_v17 = vunpack.i.h.bf16 %v1824_v12  ;;  %v1825_v19 = vunpack.i.l.bf16 %v1824_v12  ;;  %v1855_v12 = vld [vmem:[%s2311_s5 + $0x10] sm:$0xff]  }
 0xc7f   : > { %v1204_v25 = vsel %vm743_vm9, %v1202_v3, %v1826_v17  ;;  %v1203_v26 = vsel %vm743_vm9, %v1201_v22, %v1825_v19  ;;  %v1859_v17 = vld [vmem:[%s2311_s5 + $0x30] sm:$0xff]   ;;  %v1860_v19 = vld [vmem:[%s2311_s5 + $0x38] sm:$0xff]  }
 0xc80   : > { %v1216_v14 = vpop.permute.xlu1 %1215 }
 0xc81   : > { %1741 = vmatpush3.bf16.msra.mxu1 %v1216_v14  ;;  %v1856_v14 = vld [vmem:[%s2311_s5 + $0x18] sm:$0xff]  }
 0xc82   : > { %1754 = vmatprep.subr.bf16.mxu1 %v1938_v2 }
 0xc86   : > { %v1829_v21 = vpop.permute.xlu0 %1828 }
 0xc87   : > { %v1831_v23 = vunpack.i.h.bf16 %v1829_v21  ;;  %v1830_v24 = vunpack.i.l.bf16 %v1829_v21  ;;  %v1306_v21 = vsub.s32 6, %v2108_v11 }
 0xc89   : > { %v1207_v27 = vsel %vm1205_vm10, %v1204_v25, %v1831_v23  ;;  %v1206_v28 = vsel %vm1205_vm10, %v1203_v26, %v1830_v24  ;;  %v1307_v3 = vrot.slane %v2114_v13, %v1306_v21 }
 0xc8a   : > { %v1208_v44 = vpack.c.bf16 %v1207_v27, %v1206_v28 }
 0xc8c   : > { %1743 = vmatmul.mubr.msk.bf16.vlgmr.msra.gmra.mrb[24].mxu1 %vm509_vm1, %v1208_v44 }
 0xc8d   : > { %1770 = vmatprep.mubr.msk.bf16.mxu1 %vm1939_vm2, %v1938_v2  ;;  %1755 = vmatpush3.bf16.msra.mxu1 %v1853_v9 }
 0xc8e   : > { %1756 = vmatprep.subr.bf16.mxu1 %v1938_v2 }
 0xc91   : > { %1757 = vmatpush3.bf16.msra.mxu1 %v1854_v10 }
 0xc92   : > { %1758 = vmatprep.subr.bf16.mxu1 %v1938_v2 }
 0xc95   : > { %1759 = vmatpush3.bf16.msra.mxu1 %v1855_v12 }
 0xc96   : > { %1760 = vmatprep.subr.bf16.mxu1 %v1938_v2 }
 0xc99   : > { %1761 = vmatpush3.bf16.msra.mxu1 %v1856_v14 }
 0xc9a   : > { %1762 = vmatprep.subr.bf16.mxu1 %v1938_v2 }
 0xc9d   : > { %1763 = vmatpush3.bf16.msra.mxu1 %v1857_v15 }
 0xc9e   : > { %1764 = vmatprep.subr.bf16.mxu1 %v1938_v2 }
 0xca1   : > { %1765 = vmatpush3.bf16.msra.mxu1 %v1858_v16 }
 0xca2   : > { %1766 = vmatprep.subr.bf16.mxu1 %v1938_v2 }
 0xca5   : > { %1767 = vmatpush3.bf16.msra.mxu1 %v1859_v17 }
 0xca6   : > { %1768 = vmatprep.subr.bf16.mxu1 %v1938_v2 }
 0xca9   : > { %1769 = vmatpush3.bf16.msra.mxu1 %v1860_v19 }
 0xd5f   : > { %v1256_v30 = vpop.f32.mrb[24].mxu1 }
 0xd60   : > { %v1257_v18 = vadd.f32 %v1256_v30, %v1212_v20  ;;  %v1744_v31 = vpop.f32.mrb[25].mxu1 }
 0xd61   : > { %v1259_v46 = vpop.f32.mrb[26].mxu1 }
 0xd62   : > { %v2226_v32 = vadd.f32 %v1257_v18, %v2076_v51  ;;  %v1260_v33 = vadd.f32 %v1259_v46, %v1212_v20  ;;  %v1745_v35 = vpop.f32.mrb[27].mxu1 }
 0xd64   : > { %v2229_v36 = vadd.f32 %v1260_v33, %v2080_v53  ;;  %v1265_v37 = vsel %vm509_vm1, %v2226_v32, 0.0 }
 0xd65   : > { %1266 = vadd.xlane.f32.xlu0 %v1265_v37 }
 0xd66   : > { %v1268_v38 = vsel %vm509_vm1, %v2229_v36, 0.0 }
 0xd67   : > { %1269 = vadd.xlane.f32.xlu1 %v1268_v38 }
 0xdf2   : > { %v1267_v39 = vpop.xlane.xlu0 %1266 }
 0xdf3   : > { %v1271_v40 = vmul.f32 0.03125, %v1267_v39  ;;  %v1470_v39 = vsub.s32 7, %v2108_v11 }
 0xdf4   : > { %v1270_v41 = vpop.xlane.xlu1 %1269 }
 0xdf5   : > { %v1273_v42 = vsub.f32 %v2226_v32, %v1271_v40  ;;  %v1272_v51 = vmul.f32 0.03125, %v1270_v41  ;;  %v1471_v40 = vrot.slane %v2114_v13, %v1470_v39 }
 0xdf7   : > { %v1274_v43 = vsub.f32 %v2229_v36, %v1272_v51  ;;  %v1275_v45 = vmul.f32 %v1273_v42, %v1273_v42 }
 0xdf9   : > { %v1277_v53 = vsel %vm509_vm1, %v1275_v45, 0.0  ;;  %v1276_v47 = vmul.f32 %v1274_v43, %v1274_v43 }
 0xdfa   : > { %1278 = vadd.xlane.f32.xlu0 %v1277_v53 }
 0xdfb   : > { %v1280_v48 = vsel %vm509_vm1, %v1276_v47, 0.0 }
 0xdfe   : > { %1281 = vadd.xlane.f32.xlu0 %v1280_v48 }
 0xe87   : > { %v1279_v52 = vpop.xlane.xlu0 %1278 }
 0xe88   : > { %v1283_v54 = vmul.f32 0.03125, %v1279_v52 }
 0xe8a   : > { %v1285_v1 = vadd.f32 1e-05, %v1283_v54 }
 0xe8b   : > { %v1282_v55 = vpop.xlane.xlu0 %1281 }
 0xe8c   : > { %1901 = vrsqrt.f32 %v1285_v1  ;;  %v1284_v56 = vmul.f32 0.03125, %v1282_v55 }
 0xe8e   : > { %v1286_v34 = vadd.f32 1e-05, %v1284_v56 }
 0xe90   : > { %1903 = vrsqrt.f32 %v1286_v34 }
 0xe96   : > { %v1902_v58 = vpop.eup %1901 }
 0xe97   : > { %v1289_v60 = vmul.f32 %v1902_v58, %v1273_v42 }
 0xe99   : > { %v1295_v63 = vmul.f32 %v1294_v59, %v1289_v60 }
 0xe9a   : > { %v1904_v62 = vpop.eup %1903 }
 0xe9b   : > { %v1290_v0 = vmul.f32 %v1904_v62, %v1274_v43  ;;  %v1301_v6 = vadd.f32 %v1300_v4, %v1295_v63 }
 0xe9d   : > { %v1296_v5 = vmul.f32 %v1294_v59, %v1290_v0 }
 0xe9f   : > { %v1302_v7 = vadd.f32 %v1300_v4, %v1296_v5 }
 0xea1   : > { %v1303_v8 = vpack.c.bf16 %v1302_v7, %v1301_v6 }
 0xea3   : > { %1751 = vmatmul.mubr.msk.bf16.vlgmr.msra.gmra.mrb[16].mxu0 %vm509_vm1, %v1303_v8 }
 0xf76   : > { %v1353_v22 = vpop.f32.mrb[16].mxu0 }
 0xf77   : > { %v1354_v23 = vadd.f32 %v1353_v22, %v1307_v3  ;;  %v1752_v24 = vpop.f32.mrb[17].mxu0 }
 0xf78   : > { %v1356_v25 = vpop.f32.mrb[18].mxu0 }
 0xf79   : > { %v1634_v26 = vmul.f32 -1.702, %v1354_v23  ;;  %v1357_v27 = vadd.f32 %v1356_v25, %v1307_v3  ;;  %v1753_v28 = vpop.f32.mrb[19].mxu0 }
 0xf7b   : > { %v1364_v44 = vmul.f32 1.442695, %v1634_v26  ;;  %v1635_v29 = vmul.f32 -1.702, %v1357_v27 }
 0xf7d   : > { %1905 = vpow2.f32 %v1364_v44  ;;  %v1366_v2 = vmul.f32 1.442695, %v1635_v29 }
 0xf7f   : > { %1907 = vpow2.f32 %v1366_v2 }
 0xf87   : > { %v1906_v20 = vpop.eup %1905 }
 0xf88   : > { %v1368_v30 = vadd.f32 1.0, %v1906_v20 }
 0xf89   : > { %v1908_v18 = vpop.eup %1907 }
 0xf8a   : > { %1909 = vrcp.f32 %v1368_v30  ;;  %v1369_v31 = vadd.f32 1.0, %v1908_v18 }
 0xf8c   : > { %1911 = vrcp.f32 %v1369_v31 }
 0xf94   : > { %v1910_v46 = vpop.eup %1909 }
 0xf95   : > { %v1374_v35 = vmul.f32 %v1910_v46, %v1354_v23 }
 0xf96   : > { %v1912_v33 = vpop.eup %1911 }
 0xf97   : > { %v1375_v37 = vmul.f32 %v1912_v33, %v1357_v27 }
 0xf99   : > { %v1376_v38 = vpack.c.bf16 %v1375_v37, %v1374_v35 }
 0xf9b   : > { %1771 = vmatmul.mubr.bf16.vlgmr.msra.gmra.mrb[28].mxu1 %v1376_v38 }
0x106e   : > { %v1459_v41 = vpop.f32.mrb[28].mxu1 }
0x106f   : > { %v1466_v42 = vadd.f32 %v1459_v41, %v2226_v32  ;;  %v1772_v51 = vpop.f32.mrb[29].mxu1 }
0x1070   : > { %v1462_v43 = vpop.f32.mrb[30].mxu1 }
0x1071   : > { %v1472_v45 = vadd.f32 %v1471_v40, %v1466_v42  ;;  %v1467_v53 = vadd.f32 %v1462_v43, %v2229_v36  ;;  %v1773_v47 = vpop.f32.mrb[31].mxu1 }
0x1073   : > { %1474 = vst.msk [vmem:[#allocation2] sm:$0xff] %vm509_vm1, %v1472_v45  ;;  %1479 = vst.msk [vmem:[%s347_s12] sm:$0xff] %vm509_vm1, %v1472_v45  ;;  %v1473_v11 = vadd.f32 %v1471_v40, %v1467_v53 }
0x1075   : > { %1475 = vst.msk [vmem:[#allocation2 + $0x8] sm:$0xff] %vm509_vm1, %v1473_v11  ;;  %1480 = vst.msk [vmem:[%s347_s12 + $0x8] sm:$0xff] %vm509_vm1, %v1473_v11 }
0x1076 PF: > { %s17_s26 = sadd.s32 1, %s1935_s26   ;;  %s2314_s24 = smov %s1931_s25 }
0x1077   : > { %p14_p5 = scmp.ge.s32.totalorder %s17_s26, 4   ;;  %s2315_s25 = smov %s2317_s27 }
0x1079   :  { %16 = sbr.rel (!%p14_p5) target bundleno = 2 (0x2), region = 95 }

</bundles_post_ra>
